<compile_context>
chip_gen: v6e
topology: v6e:2x2x1
jax: 0.10.0
libtpu: 0.0.40
codegen_flags: <defaults>
</compile_context>

<pallas_src>
import math

import numpy as np
import jax
import jax.numpy as jnp
from jax.experimental import pallas as pl
from jax.experimental.pallas import tpu as pltpu

LN_EPS = 1e-6


# ----------------------------------------------------------------------------
# generation-aware tiling budget (review: v5e/v6e single TC + 128 MiB VMEM vs
# v7x dual TC + 64 MiB VMEM).  Only the documented vmem_capacity_bytes field is
# used; falls back to the most conservative (v7x-safe) plan if the query fails.
# ----------------------------------------------------------------------------
_BUDGET = None


def _tpu_budget():
    global _BUDGET
    if _BUDGET is None:
        vmem = 64 << 20
        try:
            vmem = int(pltpu.get_tpu_info().vmem_capacity_bytes)
        except Exception:
            pass
        if vmem >= (100 << 20):
            # v5e / v6e class: 128 MiB VMEM, one TensorCore -> one big block.
            _BUDGET = dict(row_cap=512, vmem_limit=64 << 20, min_blocks=1)
        else:
            # v7x class: 64 MiB VMEM, two TensorCores -> >=2 blocks, tighter.
            _BUDGET = dict(row_cap=256, vmem_limit=32 << 20, min_blocks=2)
    return _BUDGET


def _round_up(a, b):
    return ((a + b - 1) // b) * b


def _plan_rows(R):
    """Row-tile plan: multiple of 8 (sublane), capped for VMEM; split into
    >= min_blocks grid steps only on multi-TensorCore chips."""
    b = _tpu_budget()
    if b["min_blocks"] > 1 and R > 8:
        tr = _round_up(pl.cdiv(R, b["min_blocks"]), 8)
    else:
        tr = _round_up(R, 8)
    tr = max(8, min(b["row_cap"], tr))
    r_pad = _round_up(R, tr)
    return tr, r_pad // tr, r_pad


# ----------------------------------------------------------------------------
# fused Pallas kernel: LN1 -> spectral mix -> LN2 -> MLP -> +residual
# ----------------------------------------------------------------------------
def _gelu_tanh(x):
    # tanh-form GELU: the tanh goes to the EUP slot instead of a long VALU
    # polynomial + divide (review: v5e VALU relief).
    c = 0.7978845608028654  # sqrt(2/pi)
    return 0.5 * x * (1.0 + jnp.tanh(c * (x + 0.044715 * x * x * x)))


def _ln_stats(v, proj_bf16, tr):
    """Per-token mean / variance in the flat (rows, W*C) layout with ONE bf16
    MXU matmul on the stacked [v ; v*v] operand (var = E[v^2] - mu^2)."""
    stacked = jnp.concatenate([v, v * v], axis=0).astype(jnp.bfloat16)
    stats = jnp.dot(stacked, proj_bf16, preferred_element_type=jnp.float32)
    mu = stats[:tr]
    var = jnp.maximum(stats[tr:] - mu * mu, 0.0)
    return mu, var


def _fused_kernel(x_ref, proj_ref, wspec_ref, sbias_ref, g2_ref, be2_ref,
                  w1_ref, b1_ref, w2_ref, b2_ref, o_ref):
    # x_ref : (TR, W*C) rows of the original input (also the residual).
    # proj  : (W*C, W*C) bf16 block-diagonal per-token averaging projector.
    # wspec : (W*C, W*C) bf16 Kronecker spectral weight, LN1 gamma folded in.
    # sbias : (1, W*C)   f32  LN1 beta pushed through the spectral weight.
    # g2/be2: (1, W*C)   f32  LN2 gamma / beta tiled over W.
    # w1/b1 : (W*C, W*D) bf16 kron(I_W, w1) / (1, W*D) f32 tiled bias.
    # w2/b2 : (W*D, W*C) bf16 kron(I_W, w2) / (1, W*C) f32 tiled bias.
    x = x_ref[...].astype(jnp.float32)
    tr = x.shape[0]
    proj = proj_ref[...]

    # ---- LN1 (affine folded into wspec/sbias) + spectral channel mix -------
    mu1, var1 = _ln_stats(x, proj, tr)
    xhat = (x - mu1) * jax.lax.rsqrt(var1 + LN_EPS)
    y = jnp.dot(xhat.astype(jnp.bfloat16), wspec_ref[...],
                preferred_element_type=jnp.float32) + sbias_ref[...]

    # ---- dropout: identity in eval mode; LN2 --------------------------------
    mu2, var2 = _ln_stats(y, proj, tr)
    yn = (y - mu2) * jax.lax.rsqrt(var2 + LN_EPS) * g2_ref[...] + be2_ref[...]

    # ---- MLP with block-diagonal kron weights (stays lane-dense) -----------
    h = jnp.dot(yn.astype(jnp.bfloat16), w1_ref[...],
                preferred_element_type=jnp.float32) + b1_ref[...]
    h = _gelu_tanh(h)
    z = jnp.dot(h.astype(jnp.bfloat16), w2_ref[...],
                preferred_element_type=jnp.float32) + b2_ref[...]

    # ---- residual ------------------------------------------------------------
    o_ref[...] = (z + x).astype(o_ref.dtype)


# ----------------------------------------------------------------------------
# host-side constant prep (built ONCE, hoisted out of the forward)
# ----------------------------------------------------------------------------
def hilbert_like_matrix(W):
    """Real matrix equivalent of irfft_W(i * rfft_W(v)) for real v (ortho norm).
    DC and Nyquist bins contribute zero (i * real bin is dropped by irfft)."""
    if W <= 2:
        return np.zeros((W, W), np.float32)
    k = np.arange(1, (W - 1) // 2 + 1, dtype=np.float64)
    d = (np.arange(W)[:, None] - np.arange(W)[None, :]).astype(np.float64)
    m = -(2.0 / W) * np.sin(2.0 * np.pi * k[None, None, :] * d[:, :, None] / W).sum(-1)
    return m.astype(np.float32)


_CONST_KEYS = ("proj", "wspec", "sbias", "ln2_g_row", "ln2_b_row",
               "w1k", "b1_row", "w2k", "b2_row")


def prepare_scale_constants(params, sequence_lengths):
    """Per-scale constants, all casts / kron expansions / LN folds done here so
    the jitted forward never re-creates them (review: hoist weight prep)."""
    C = params["wc_re"].shape[0]
    # NOTE: 1/C is exact in bf16 for power-of-two C; keep proj f32 otherwise.
    mean_c = jnp.full((C, C), 1.0 / C, jnp.float32)
    consts = []
    for L in sequence_lengths:
        H = int(math.isqrt(L))
        W = H
        assert H * W == L, "each scale must hold a square number of tokens"
        m = jnp.asarray(hilbert_like_matrix(W), jnp.float32)          # (W, W)
        eye_w = jnp.eye(W, dtype=jnp.float32)
        # irfft2(rfft2(X) @ Wc) == X @ Re(Wc) + (M @_W X) @ Im(Wc)
        #  -> flat:  x_flat @ [ kron(I_W, Re) + kron(M^T, Im) ]
        big = jnp.kron(eye_w, params["wc_re"]) + jnp.kron(m.T, params["wc_im"])
        g1_t = jnp.tile(params["ln1_g"].reshape(-1), W)               # (W*C,)
        b1_t = jnp.tile(params["ln1_b"].reshape(-1), W)
        consts.append(dict(
            proj=jnp.kron(eye_w, mean_c).astype(jnp.bfloat16),        # (WC, WC)
            wspec=(g1_t[:, None] * big).astype(jnp.bfloat16),         # gamma folded
            sbias=(b1_t[None, :] @ big).astype(jnp.float32),          # beta folded
            ln2_g_row=jnp.tile(params["ln2_g"], (1, W)).astype(jnp.float32),
            ln2_b_row=jnp.tile(params["ln2_b"], (1, W)).astype(jnp.float32),
            w1k=jnp.kron(eye_w, params["w1"]).astype(jnp.bfloat16),   # (WC, WD)
            b1_row=jnp.tile(params["b1"], (1, W)).astype(jnp.float32),
            w2k=jnp.kron(eye_w, params["w2"]).astype(jnp.bfloat16),   # (WD, WC)
            b2_row=jnp.tile(params["b2"], (1, W)).astype(jnp.float32),
        ))
    return consts


# ----------------------------------------------------------------------------
# wrappers
# ----------------------------------------------------------------------------
def _full_spec(shape):
    nd = len(shape)
    return pl.BlockSpec(shape, lambda *_: (0,) * nd)


def _fused_scale(x_flat, cst):
    R, WC = x_flat.shape
    tr, grid_r, r_pad = _plan_rows(R)
    if r_pad != R:
        x_flat = jnp.pad(x_flat, ((0, r_pad - R), (0, 0)))
    out = pl.pallas_call(
        _fused_kernel,
        out_shape=jax.ShapeDtypeStruct((r_pad, WC), x_flat.dtype),
        grid=(grid_r,),
        in_specs=[pl.BlockSpec((tr, WC), lambda r: (r, 0))]
                 + [_full_spec(cst[k].shape) for k in _CONST_KEYS],
        out_specs=pl.BlockSpec((tr, WC), lambda r: (r, 0)),
        compiler_params=pltpu.CompilerParams(
            dimension_semantics=("parallel",),
            vmem_limit_bytes=_tpu_budget()["vmem_limit"]),
    )(x_flat, *[cst[k] for k in _CONST_KEYS])
    return out[:R] if r_pad != R else out


def spectral_block_forward(x, sequence_lengths, scale_consts):
    N, S, C = x.shape
    assert S == sum(sequence_lengths)
    outs, off = [], 0
    for L, cst in zip(sequence_lengths, scale_consts):
        H = W = int(math.isqrt(L))
        # LayerNorm is per-token, so applying LN1 per chunk == before the split.
        chunk = x[:, off:off + L, :].reshape(N * H, W * C)
        y = _fused_scale(chunk, cst)                      # (N*H, W*C), all stages fused
        outs.append(y.reshape(N, L, C))
        off += L
    return jnp.concatenate(outs, axis=1)                  # final output only


# ----------------------------------------------------------------------------
# deterministic parameter init (shapes from SpectralBlock.__init__).
# LayerNorm affines are randomized (not torch's ones/zeros) so the gamma/beta
# folding into the spectral weight is actually exercised by the test.
# ----------------------------------------------------------------------------
def init_params(key, hidden_dim, mlp_dim):
    C, D = hidden_dim, mlp_dim
    k = jax.random.split(key, 9)
    wc = 0.02 * jax.random.normal(k[0], (C, C, 2), jnp.float32)   # weight_c
    return dict(
        ln1_g=1.0 + 0.1 * jax.random.normal(k[5], (1, C), jnp.float32),
        ln1_b=0.05 * jax.random.normal(k[6], (1, C), jnp.float32),
        wc_re=wc[..., 0],
        wc_im=wc[..., 1],
        ln2_g=1.0 + 0.1 * jax.random.normal(k[7], (1, C), jnp.float32),
        ln2_b=0.05 * jax.random.normal(k[8], (1, C), jnp.float32),
        # torch stores Linear weights as (out, in); kept as (in, out) so the
        # kernel computes x @ W directly.
        w1=0.2 * jax.random.normal(k[1], (C, D), jnp.float32),
        b1=0.02 * jax.random.normal(k[2], (1, D), jnp.float32),
        w2=0.2 * jax.random.normal(k[3], (D, C), jnp.float32),
        b2=0.02 * jax.random.normal(k[4], (1, C), jnp.float32),
    )


# ----------------------------------------------------------------------------
# numpy float64 reference (mirrors the torch forward: real FFTs, exact GELU)
# ----------------------------------------------------------------------------
def reference_forward_np(x, params, sequence_lengths):
    erf = np.vectorize(math.erf, otypes=[np.float64])
    p = {k: np.asarray(v, np.float64) for k, v in params.items()}
    x = np.asarray(x, np.float64)

    def ln(v, g, b):
        mu = v.mean(-1, keepdims=True)
        var = ((v - mu) ** 2).mean(-1, keepdims=True)
        return (v - mu) / np.sqrt(var + LN_EPS) * g + b

    N, S, C = x.shape
    xn = ln(x, p["ln1_g"], p["ln1_b"])
    wc = p["wc_re"] + 1j * p["wc_im"]
    outs, off = [], 0
    for L in sequence_lengths:
        H = W = int(math.isqrt(L))
        v = xn[:, off:off + L, :].reshape(N, H, W, C)
        z = np.fft.rfft2(v, axes=(1, 2), norm="ortho")
        z = z @ wc
        v = np.fft.irfft2(z, s=(H, W), axes=(1, 2), norm="ortho")
        outs.append(v.reshape(N, L, C))
        off += L
    sx = np.concatenate(outs, axis=1)
    y = ln(sx, p["ln2_g"], p["ln2_b"])
    h = y @ p["w1"] + p["b1"]
    h = 0.5 * h * (1.0 + erf(h / math.sqrt(2.0)))       # exact GELU
    return h @ p["w2"] + p["b2"] + x


if __name__ == "__main__":
    key = jax.random.PRNGKey(0)
    sequence_lengths = [64, 16]          # multiscale: 8x8 and 4x4 token grids
    hidden_dim, mlp_dim, num_heads = 32, 64, 4   # num_heads unused in forward
    N = 2
    S = sum(sequence_lengths)

    k_x, k_p = jax.random.split(key)
    x = jax.random.normal(k_x, (N, S, hidden_dim), jnp.float32)
    params = init_params(k_p, hidden_dim, mlp_dim)

    # Hoisted per-scale constants (built once, never rebuilt inside the jit).
    scale_consts = prepare_scale_constants(params, sequence_lengths)

    fwd = jax.jit(lambda xx: spectral_block_forward(xx, sequence_lengths, scale_consts))
    out = jax.block_until_ready(fwd(x))

    ref = reference_forward_np(x, params, sequence_lengths)
    assert out.shape == (N, S, hidden_dim)
    err = float(np.max(np.abs(np.asarray(out, np.float64) - ref)))
    assert np.allclose(np.asarray(out, np.float64), ref, atol=5e-2, rtol=5e-2), err
    print("KERNEL_OK")
</pallas_src>

<mosaic_0001>
module attributes {stable_mosaic.version = 11 : i64} {
  func.func @_fused_kernel(%arg0: i32, %arg1: memref<8x256xf32, #tpu.memory_space<vmem>>, %arg2: memref<256x256xbf16, #tpu.memory_space<vmem>>, %arg3: memref<256x256xbf16, #tpu.memory_space<vmem>>, %arg4: memref<1x256xf32, #tpu.memory_space<vmem>>, %arg5: memref<1x256xf32, #tpu.memory_space<vmem>>, %arg6: memref<1x256xf32, #tpu.memory_space<vmem>>, %arg7: memref<256x512xbf16, #tpu.memory_space<vmem>>, %arg8: memref<1x512xf32, #tpu.memory_space<vmem>>, %arg9: memref<512x256xbf16, #tpu.memory_space<vmem>>, %arg10: memref<1x256xf32, #tpu.memory_space<vmem>>, %arg11: memref<8x256xf32, #tpu.memory_space<vmem>>) attributes {dimension_semantics = [#tpu.dimension_semantics<parallel>], iteration_bounds = array<i64: 2>, scalar_prefetch = 0 : i64, scratch_operands = 0 : i64, tpu.core_type = #tpu.core_type<tc>, window_params = [{transform_indices = @transform_0, window_bounds = array<i64: 8, 256>}, {pipeline_mode = #tpu.pipeline_mode<synchronous>, transform_indices = @transform_1, window_bounds = array<i64: 256, 256>}, {pipeline_mode = #tpu.pipeline_mode<synchronous>, transform_indices = @transform_2, window_bounds = array<i64: 256, 256>}, {pipeline_mode = #tpu.pipeline_mode<synchronous>, transform_indices = @transform_3, window_bounds = array<i64: 1, 256>}, {pipeline_mode = #tpu.pipeline_mode<synchronous>, transform_indices = @transform_4, window_bounds = array<i64: 1, 256>}, {pipeline_mode = #tpu.pipeline_mode<synchronous>, transform_indices = @transform_5, window_bounds = array<i64: 1, 256>}, {pipeline_mode = #tpu.pipeline_mode<synchronous>, transform_indices = @transform_6, window_bounds = array<i64: 256, 512>}, {pipeline_mode = #tpu.pipeline_mode<synchronous>, transform_indices = @transform_7, window_bounds = array<i64: 1, 512>}, {pipeline_mode = #tpu.pipeline_mode<synchronous>, transform_indices = @transform_8, window_bounds = array<i64: 512, 256>}, {pipeline_mode = #tpu.pipeline_mode<synchronous>, transform_indices = @transform_9, window_bounds = array<i64: 1, 256>}, {transform_indices = @transform_10, window_bounds = array<i64: 8, 256>}]} {
    %c0 = arith.constant 0 : index
    %c0_0 = arith.constant 0 : index
    %0 = vector.load %arg1[%c0, %c0_0] : memref<8x256xf32, #tpu.memory_space<vmem>>, vector<8x256xf32>
    %c0_1 = arith.constant 0 : index
    %c0_2 = arith.constant 0 : index
    %1 = vector.load %arg2[%c0_1, %c0_2] : memref<256x256xbf16, #tpu.memory_space<vmem>>, vector<256x256xbf16>
    %2 = arith.mulf %0, %0 : vector<8x256xf32>
    %3 = tpu.concatenate %0, %2 in 0 : vector<8x256xf32>, vector<8x256xf32> -> vector<16x256xf32>
    %4 = arith.truncf %3 : vector<16x256xf32> to vector<16x256xbf16>
    %cst = arith.constant dense<0.000000e+00> : vector<16x256xf32>
    %5 = tpu.matmul %4, %1, %cst {dimension_numbers = #tpu.dot_dimension_numbers<[1], [0], [0], [1], [0, 0, 1, 1], [], []>} : vector<16x256xbf16>, vector<256x256xbf16>, vector<16x256xf32> -> vector<16x256xf32>
    %6 = vector.extract_strided_slice %5 {offsets = [0, 0], sizes = [8, 256], strides = [1, 1]} : vector<16x256xf32> to vector<8x256xf32>
    %7 = vector.extract_strided_slice %5 {offsets = [8, 0], sizes = [8, 256], strides = [1, 1]} : vector<16x256xf32> to vector<8x256xf32>
    %8 = arith.mulf %6, %6 : vector<8x256xf32>
    %9 = arith.subf %7, %8 : vector<8x256xf32>
    %cst_3 = arith.constant 0.000000e+00 : f32
    %10 = vector.broadcast %cst_3 : f32 to vector<8x256xf32>
    %11 = arith.maximumf %9, %10 : vector<8x256xf32>
    %12 = arith.subf %0, %6 : vector<8x256xf32>
    %cst_4 = arith.constant 9.99999997E-7 : f32
    %13 = vector.broadcast %cst_4 : f32 to vector<8x256xf32>
    %14 = arith.addf %11, %13 : vector<8x256xf32>
    %15 = math.rsqrt %14 : vector<8x256xf32>
    %16 = arith.mulf %12, %15 : vector<8x256xf32>
    %17 = arith.truncf %16 : vector<8x256xf32> to vector<8x256xbf16>
    %c0_5 = arith.constant 0 : index
    %c0_6 = arith.constant 0 : index
    %18 = vector.load %arg3[%c0_5, %c0_6] : memref<256x256xbf16, #tpu.memory_space<vmem>>, vector<256x256xbf16>
    %cst_7 = arith.constant dense<0.000000e+00> : vector<8x256xf32>
    %19 = tpu.matmul %17, %18, %cst_7 {dimension_numbers = #tpu.dot_dimension_numbers<[1], [0], [0], [1], [0, 0, 1, 1], [], []>} : vector<8x256xbf16>, vector<256x256xbf16>, vector<8x256xf32> -> vector<8x256xf32>
    %c0_8 = arith.constant 0 : index
    %c0_9 = arith.constant 0 : index
    %20 = vector.load %arg4[%c0_8, %c0_9] : memref<1x256xf32, #tpu.memory_space<vmem>>, vector<1x256xf32>
    %21 = vector.broadcast %20 : vector<1x256xf32> to vector<8x256xf32>
    %22 = arith.addf %19, %21 : vector<8x256xf32>
    %23 = arith.mulf %22, %22 : vector<8x256xf32>
    %24 = tpu.concatenate %22, %23 in 0 : vector<8x256xf32>, vector<8x256xf32> -> vector<16x256xf32>
    %25 = arith.truncf %24 : vector<16x256xf32> to vector<16x256xbf16>
    %cst_10 = arith.constant dense<0.000000e+00> : vector<16x256xf32>
    %26 = tpu.matmul %25, %1, %cst_10 {dimension_numbers = #tpu.dot_dimension_numbers<[1], [0], [0], [1], [0, 0, 1, 1], [], []>} : vector<16x256xbf16>, vector<256x256xbf16>, vector<16x256xf32> -> vector<16x256xf32>
    %27 = vector.extract_strided_slice %26 {offsets = [0, 0], sizes = [8, 256], strides = [1, 1]} : vector<16x256xf32> to vector<8x256xf32>
    %28 = vector.extract_strided_slice %26 {offsets = [8, 0], sizes = [8, 256], strides = [1, 1]} : vector<16x256xf32> to vector<8x256xf32>
    %29 = arith.mulf %27, %27 : vector<8x256xf32>
    %30 = arith.subf %28, %29 : vector<8x256xf32>
    %cst_11 = arith.constant 0.000000e+00 : f32
    %31 = vector.broadcast %cst_11 : f32 to vector<8x256xf32>
    %32 = arith.maximumf %30, %31 : vector<8x256xf32>
    %33 = arith.subf %22, %27 : vector<8x256xf32>
    %cst_12 = arith.constant 9.99999997E-7 : f32
    %34 = vector.broadcast %cst_12 : f32 to vector<8x256xf32>
    %35 = arith.addf %32, %34 : vector<8x256xf32>
    %36 = math.rsqrt %35 : vector<8x256xf32>
    %37 = arith.mulf %33, %36 : vector<8x256xf32>
    %c0_13 = arith.constant 0 : index
    %c0_14 = arith.constant 0 : index
    %38 = vector.load %arg5[%c0_13, %c0_14] : memref<1x256xf32, #tpu.memory_space<vmem>>, vector<1x256xf32>
    %39 = vector.broadcast %38 : vector<1x256xf32> to vector<8x256xf32>
    %40 = arith.mulf %37, %39 : vector<8x256xf32>
    %c0_15 = arith.constant 0 : index
    %c0_16 = arith.constant 0 : index
    %41 = vector.load %arg6[%c0_15, %c0_16] : memref<1x256xf32, #tpu.memory_space<vmem>>, vector<1x256xf32>
    %42 = vector.broadcast %41 : vector<1x256xf32> to vector<8x256xf32>
    %43 = arith.addf %40, %42 : vector<8x256xf32>
    %44 = arith.truncf %43 : vector<8x256xf32> to vector<8x256xbf16>
    %c0_17 = arith.constant 0 : index
    %c0_18 = arith.constant 0 : index
    %45 = vector.load %arg7[%c0_17, %c0_18] : memref<256x512xbf16, #tpu.memory_space<vmem>>, vector<256x512xbf16>
    %cst_19 = arith.constant dense<0.000000e+00> : vector<8x512xf32>
    %46 = tpu.matmul %44, %45, %cst_19 {dimension_numbers = #tpu.dot_dimension_numbers<[1], [0], [0], [1], [0, 0, 1, 1], [], []>} : vector<8x256xbf16>, vector<256x512xbf16>, vector<8x512xf32> -> vector<8x512xf32>
    %c0_20 = arith.constant 0 : index
    %c0_21 = arith.constant 0 : index
    %47 = vector.load %arg8[%c0_20, %c0_21] : memref<1x512xf32, #tpu.memory_space<vmem>>, vector<1x512xf32>
    %48 = vector.broadcast %47 : vector<1x512xf32> to vector<8x512xf32>
    %49 = arith.addf %46, %48 : vector<8x512xf32>
    %cst_22 = arith.constant 5.000000e-01 : f32
    %50 = vector.broadcast %cst_22 : f32 to vector<8x512xf32>
    %51 = arith.mulf %50, %49 : vector<8x512xf32>
    %cst_23 = arith.constant 4.471500e-02 : f32
    %52 = vector.broadcast %cst_23 : f32 to vector<8x512xf32>
    %53 = arith.mulf %52, %49 : vector<8x512xf32>
    %54 = arith.mulf %53, %49 : vector<8x512xf32>
    %55 = arith.mulf %54, %49 : vector<8x512xf32>
    %56 = arith.addf %49, %55 : vector<8x512xf32>
    %cst_24 = arith.constant 0.797884583 : f32
    %57 = vector.broadcast %cst_24 : f32 to vector<8x512xf32>
    %58 = arith.mulf %57, %56 : vector<8x512xf32>
    %59 = math.tanh %58 : vector<8x512xf32>
    %cst_25 = arith.constant 1.000000e+00 : f32
    %60 = vector.broadcast %cst_25 : f32 to vector<8x512xf32>
    %61 = arith.addf %60, %59 : vector<8x512xf32>
    %62 = arith.mulf %51, %61 : vector<8x512xf32>
    %63 = arith.truncf %62 : vector<8x512xf32> to vector<8x512xbf16>
    %c0_26 = arith.constant 0 : index
    %c0_27 = arith.constant 0 : index
    %64 = vector.load %arg9[%c0_26, %c0_27] : memref<512x256xbf16, #tpu.memory_space<vmem>>, vector<512x256xbf16>
    %cst_28 = arith.constant dense<0.000000e+00> : vector<8x256xf32>
    %65 = tpu.matmul %63, %64, %cst_28 {dimension_numbers = #tpu.dot_dimension_numbers<[1], [0], [0], [1], [0, 0, 1, 1], [], []>} : vector<8x512xbf16>, vector<512x256xbf16>, vector<8x256xf32> -> vector<8x256xf32>
    %c0_29 = arith.constant 0 : index
    %c0_30 = arith.constant 0 : index
    %66 = vector.load %arg10[%c0_29, %c0_30] : memref<1x256xf32, #tpu.memory_space<vmem>>, vector<1x256xf32>
    %67 = vector.broadcast %66 : vector<1x256xf32> to vector<8x256xf32>
    %68 = arith.addf %65, %67 : vector<8x256xf32>
    %69 = arith.addf %68, %0 : vector<8x256xf32>
    %c0_31 = arith.constant 0 : index
    %c0_32 = arith.constant 0 : index
    %70 = vector.load %arg11[%c0_31, %c0_32] : memref<8x256xf32, #tpu.memory_space<vmem>>, vector<8x256xf32>
    tpu.vector_store %arg11[%c0_31, %c0_32], %69 {strides = array<i32>} : memref<8x256xf32, #tpu.memory_space<vmem>>, vector<8x256xf32>,
    return
  }
  func.func @transform_0(%arg0: i32) -> (i32, i32) {
    %c0_i32 = arith.constant 0 : i32
    %c0_i32_0 = arith.constant 0 : i32
    return %arg0, %c0_i32 : i32, i32
  }
  func.func @transform_1(%arg0: i32) -> (i32, i32) {
    %c0_i32 = arith.constant 0 : i32
    %c0_i32_0 = arith.constant 0 : i32
    %c0_i32_1 = arith.constant 0 : i32
    return %c0_i32, %c0_i32_0 : i32, i32
  }
  func.func @transform_2(%arg0: i32) -> (i32, i32) {
    %c0_i32 = arith.constant 0 : i32
    %c0_i32_0 = arith.constant 0 : i32
    %c0_i32_1 = arith.constant 0 : i32
    return %c0_i32, %c0_i32_0 : i32, i32
  }
  func.func @transform_3(%arg0: i32) -> (i32, i32) {
    %c0_i32 = arith.constant 0 : i32
    %c0_i32_0 = arith.constant 0 : i32
    %c0_i32_1 = arith.constant 0 : i32
    return %c0_i32, %c0_i32_0 : i32, i32
  }
  func.func @transform_4(%arg0: i32) -> (i32, i32) {
    %c0_i32 = arith.constant 0 : i32
    %c0_i32_0 = arith.constant 0 : i32
    %c0_i32_1 = arith.constant 0 : i32
    return %c0_i32, %c0_i32_0 : i32, i32
  }
  func.func @transform_5(%arg0: i32) -> (i32, i32) {
    %c0_i32 = arith.constant 0 : i32
    %c0_i32_0 = arith.constant 0 : i32
    %c0_i32_1 = arith.constant 0 : i32
    return %c0_i32, %c0_i32_0 : i32, i32
  }
  func.func @transform_6(%arg0: i32) -> (i32, i32) {
    %c0_i32 = arith.constant 0 : i32
    %c0_i32_0 = arith.constant 0 : i32
    %c0_i32_1 = arith.constant 0 : i32
    return %c0_i32, %c0_i32_0 : i32, i32
  }
  func.func @transform_7(%arg0: i32) -> (i32, i32) {
    %c0_i32 = arith.constant 0 : i32
    %c0_i32_0 = arith.constant 0 : i32
    %c0_i32_1 = arith.constant 0 : i32
    return %c0_i32, %c0_i32_0 : i32, i32
  }
  func.func @transform_8(%arg0: i32) -> (i32, i32) {
    %c0_i32 = arith.constant 0 : i32
    %c0_i32_0 = arith.constant 0 : i32
    %c0_i32_1 = arith.constant 0 : i32
    return %c0_i32, %c0_i32_0 : i32, i32
  }
  func.func @transform_9(%arg0: i32) -> (i32, i32) {
    %c0_i32 = arith.constant 0 : i32
    %c0_i32_0 = arith.constant 0 : i32
    %c0_i32_1 = arith.constant 0 : i32
    return %c0_i32, %c0_i32_0 : i32, i32
  }
  func.func @transform_10(%arg0: i32) -> (i32, i32) {
    %c0_i32 = arith.constant 0 : i32
    %c0_i32_0 = arith.constant 0 : i32
    return %arg0, %c0_i32 : i32, i32
  }
}

module attributes {stable_mosaic.version = 11 : i64} {
  func.func @_fused_kernel(%arg0: i32, %arg1: memref<8x128xf32, #tpu.memory_space<vmem>>, %arg2: memref<128x128xbf16, #tpu.memory_space<vmem>>, %arg3: memref<128x128xbf16, #tpu.memory_space<vmem>>, %arg4: memref<1x128xf32, #tpu.memory_space<vmem>>, %arg5: memref<1x128xf32, #tpu.memory_space<vmem>>, %arg6: memref<1x128xf32, #tpu.memory_space<vmem>>, %arg7: memref<128x256xbf16, #tpu.memory_space<vmem>>, %arg8: memref<1x256xf32, #tpu.memory_space<vmem>>, %arg9: memref<256x128xbf16, #tpu.memory_space<vmem>>, %arg10: memref<1x128xf32, #tpu.memory_space<vmem>>, %arg11: memref<8x128xf32, #tpu.memory_space<vmem>>) attributes {dimension_semantics = [#tpu.dimension_semantics<parallel>], iteration_bounds = array<i64: 1>, scalar_prefetch = 0 : i64, scratch_operands = 0 : i64, tpu.core_type = #tpu.core_type<tc>, window_params = [{transform_indices = @transform_0, window_bounds = array<i64: 8, 128>}, {pipeline_mode = #tpu.pipeline_mode<synchronous>, transform_indices = @transform_1, window_bounds = array<i64: 128, 128>}, {pipeline_mode = #tpu.pipeline_mode<synchronous>, transform_indices = @transform_2, window_bounds = array<i64: 128, 128>}, {pipeline_mode = #tpu.pipeline_mode<synchronous>, transform_indices = @transform_3, window_bounds = array<i64: 1, 128>}, {pipeline_mode = #tpu.pipeline_mode<synchronous>, transform_indices = @transform_4, window_bounds = array<i64: 1, 128>}, {pipeline_mode = #tpu.pipeline_mode<synchronous>, transform_indices = @transform_5, window_bounds = array<i64: 1, 128>}, {pipeline_mode = #tpu.pipeline_mode<synchronous>, transform_indices = @transform_6, window_bounds = array<i64: 128, 256>}, {pipeline_mode = #tpu.pipeline_mode<synchronous>, transform_indices = @transform_7, window_bounds = array<i64: 1, 256>}, {pipeline_mode = #tpu.pipeline_mode<synchronous>, transform_indices = @transform_8, window_bounds = array<i64: 256, 128>}, {pipeline_mode = #tpu.pipeline_mode<synchronous>, transform_indices = @transform_9, window_bounds = array<i64: 1, 128>}, {transform_indices = @transform_10, window_bounds = array<i64: 8, 128>}]} {
    %c0 = arith.constant 0 : index
    %c0_0 = arith.constant 0 : index
    %0 = vector.load %arg1[%c0, %c0_0] : memref<8x128xf32, #tpu.memory_space<vmem>>, vector<8x128xf32>
    %c0_1 = arith.constant 0 : index
    %c0_2 = arith.constant 0 : index
    %1 = vector.load %arg2[%c0_1, %c0_2] : memref<128x128xbf16, #tpu.memory_space<vmem>>, vector<128x128xbf16>
    %2 = arith.mulf %0, %0 : vector<8x128xf32>
    %3 = tpu.concatenate %0, %2 in 0 : vector<8x128xf32>, vector<8x128xf32> -> vector<16x128xf32>
    %4 = arith.truncf %3 : vector<16x128xf32> to vector<16x128xbf16>
    %cst = arith.constant dense<0.000000e+00> : vector<16x128xf32>
    %5 = tpu.matmul %4, %1, %cst {dimension_numbers = #tpu.dot_dimension_numbers<[1], [0], [0], [1], [0, 0, 1, 1], [], []>} : vector<16x128xbf16>, vector<128x128xbf16>, vector<16x128xf32> -> vector<16x128xf32>
    %6 = vector.extract_strided_slice %5 {offsets = [0, 0], sizes = [8, 128], strides = [1, 1]} : vector<16x128xf32> to vector<8x128xf32>
    %7 = vector.extract_strided_slice %5 {offsets = [8, 0], sizes = [8, 128], strides = [1, 1]} : vector<16x128xf32> to vector<8x128xf32>
    %8 = arith.mulf %6, %6 : vector<8x128xf32>
    %9 = arith.subf %7, %8 : vector<8x128xf32>
    %cst_3 = arith.constant 0.000000e+00 : f32
    %10 = vector.broadcast %cst_3 : f32 to vector<8x128xf32>
    %11 = arith.maximumf %9, %10 : vector<8x128xf32>
    %12 = arith.subf %0, %6 : vector<8x128xf32>
    %cst_4 = arith.constant 9.99999997E-7 : f32
    %13 = vector.broadcast %cst_4 : f32 to vector<8x128xf32>
    %14 = arith.addf %11, %13 : vector<8x128xf32>
    %15 = math.rsqrt %14 : vector<8x128xf32>
    %16 = arith.mulf %12, %15 : vector<8x128xf32>
    %17 = arith.truncf %16 : vector<8x128xf32> to vector<8x128xbf16>
    %c0_5 = arith.constant 0 : index
    %c0_6 = arith.constant 0 : index
    %18 = vector.load %arg3[%c0_5, %c0_6] : memref<128x128xbf16, #tpu.memory_space<vmem>>, vector<128x128xbf16>
    %cst_7 = arith.constant dense<0.000000e+00> : vector<8x128xf32>
    %19 = tpu.matmul %17, %18, %cst_7 {dimension_numbers = #tpu.dot_dimension_numbers<[1], [0], [0], [1], [0, 0, 1, 1], [], []>} : vector<8x128xbf16>, vector<128x128xbf16>, vector<8x128xf32> -> vector<8x128xf32>
    %c0_8 = arith.constant 0 : index
    %c0_9 = arith.constant 0 : index
    %20 = vector.load %arg4[%c0_8, %c0_9] : memref<1x128xf32, #tpu.memory_space<vmem>>, vector<1x128xf32>
    %21 = vector.broadcast %20 : vector<1x128xf32> to vector<8x128xf32>
    %22 = arith.addf %19, %21 : vector<8x128xf32>
    %23 = arith.mulf %22, %22 : vector<8x128xf32>
    %24 = tpu.concatenate %22, %23 in 0 : vector<8x128xf32>, vector<8x128xf32> -> vector<16x128xf32>
    %25 = arith.truncf %24 : vector<16x128xf32> to vector<16x128xbf16>
    %cst_10 = arith.constant dense<0.000000e+00> : vector<16x128xf32>
    %26 = tpu.matmul %25, %1, %cst_10 {dimension_numbers = #tpu.dot_dimension_numbers<[1], [0], [0], [1], [0, 0, 1, 1], [], []>} : vector<16x128xbf16>, vector<128x128xbf16>, vector<16x128xf32> -> vector<16x128xf32>
    %27 = vector.extract_strided_slice %26 {offsets = [0, 0], sizes = [8, 128], strides = [1, 1]} : vector<16x128xf32> to vector<8x128xf32>
    %28 = vector.extract_strided_slice %26 {offsets = [8, 0], sizes = [8, 128], strides = [1, 1]} : vector<16x128xf32> to vector<8x128xf32>
    %29 = arith.mulf %27, %27 : vector<8x128xf32>
    %30 = arith.subf %28, %29 : vector<8x128xf32>
    %cst_11 = arith.constant 0.000000e+00 : f32
    %31 = vector.broadcast %cst_11 : f32 to vector<8x128xf32>
    %32 = arith.maximumf %30, %31 : vector<8x128xf32>
    %33 = arith.subf %22, %27 : vector<8x128xf32>
    %cst_12 = arith.constant 9.99999997E-7 : f32
    %34 = vector.broadcast %cst_12 : f32 to vector<8x128xf32>
    %35 = arith.addf %32, %34 : vector<8x128xf32>
    %36 = math.rsqrt %35 : vector<8x128xf32>
    %37 = arith.mulf %33, %36 : vector<8x128xf32>
    %c0_13 = arith.constant 0 : index
    %c0_14 = arith.constant 0 : index
    %38 = vector.load %arg5[%c0_13, %c0_14] : memref<1x128xf32, #tpu.memory_space<vmem>>, vector<1x128xf32>
    %39 = vector.broadcast %38 : vector<1x128xf32> to vector<8x128xf32>
    %40 = arith.mulf %37, %39 : vector<8x128xf32>
    %c0_15 = arith.constant 0 : index
    %c0_16 = arith.constant 0 : index
    %41 = vector.load %arg6[%c0_15, %c0_16] : memref<1x128xf32, #tpu.memory_space<vmem>>, vector<1x128xf32>
    %42 = vector.broadcast %41 : vector<1x128xf32> to vector<8x128xf32>
    %43 = arith.addf %40, %42 : vector<8x128xf32>
    %44 = arith.truncf %43 : vector<8x128xf32> to vector<8x128xbf16>
    %c0_17 = arith.constant 0 : index
    %c0_18 = arith.constant 0 : index
    %45 = vector.load %arg7[%c0_17, %c0_18] : memref<128x256xbf16, #tpu.memory_space<vmem>>, vector<128x256xbf16>
    %cst_19 = arith.constant dense<0.000000e+00> : vector<8x256xf32>
    %46 = tpu.matmul %44, %45, %cst_19 {dimension_numbers = #tpu.dot_dimension_numbers<[1], [0], [0], [1], [0, 0, 1, 1], [], []>} : vector<8x128xbf16>, vector<128x256xbf16>, vector<8x256xf32> -> vector<8x256xf32>
    %c0_20 = arith.constant 0 : index
    %c0_21 = arith.constant 0 : index
    %47 = vector.load %arg8[%c0_20, %c0_21] : memref<1x256xf32, #tpu.memory_space<vmem>>, vector<1x256xf32>
    %48 = vector.broadcast %47 : vector<1x256xf32> to vector<8x256xf32>
    %49 = arith.addf %46, %48 : vector<8x256xf32>
    %cst_22 = arith.constant 5.000000e-01 : f32
    %50 = vector.broadcast %cst_22 : f32 to vector<8x256xf32>
    %51 = arith.mulf %50, %49 : vector<8x256xf32>
    %cst_23 = arith.constant 4.471500e-02 : f32
    %52 = vector.broadcast %cst_23 : f32 to vector<8x256xf32>
    %53 = arith.mulf %52, %49 : vector<8x256xf32>
    %54 = arith.mulf %53, %49 : vector<8x256xf32>
    %55 = arith.mulf %54, %49 : vector<8x256xf32>
    %56 = arith.addf %49, %55 : vector<8x256xf32>
    %cst_24 = arith.constant 0.797884583 : f32
    %57 = vector.broadcast %cst_24 : f32 to vector<8x256xf32>
    %58 = arith.mulf %57, %56 : vector<8x256xf32>
    %59 = math.tanh %58 : vector<8x256xf32>
    %cst_25 = arith.constant 1.000000e+00 : f32
    %60 = vector.broadcast %cst_25 : f32 to vector<8x256xf32>
    %61 = arith.addf %60, %59 : vector<8x256xf32>
    %62 = arith.mulf %51, %61 : vector<8x256xf32>
    %63 = arith.truncf %62 : vector<8x256xf32> to vector<8x256xbf16>
    %c0_26 = arith.constant 0 : index
    %c0_27 = arith.constant 0 : index
    %64 = vector.load %arg9[%c0_26, %c0_27] : memref<256x128xbf16, #tpu.memory_space<vmem>>, vector<256x128xbf16>
    %cst_28 = arith.constant dense<0.000000e+00> : vector<8x128xf32>
    %65 = tpu.matmul %63, %64, %cst_28 {dimension_numbers = #tpu.dot_dimension_numbers<[1], [0], [0], [1], [0, 0, 1, 1], [], []>} : vector<8x256xbf16>, vector<256x128xbf16>, vector<8x128xf32> -> vector<8x128xf32>
    %c0_29 = arith.constant 0 : index
    %c0_30 = arith.constant 0 : index
    %66 = vector.load %arg10[%c0_29, %c0_30] : memref<1x128xf32, #tpu.memory_space<vmem>>, vector<1x128xf32>
    %67 = vector.broadcast %66 : vector<1x128xf32> to vector<8x128xf32>
    %68 = arith.addf %65, %67 : vector<8x128xf32>
    %69 = arith.addf %68, %0 : vector<8x128xf32>
    %c0_31 = arith.constant 0 : index
    %c0_32 = arith.constant 0 : index
    %70 = vector.load %arg11[%c0_31, %c0_32] : memref<8x128xf32, #tpu.memory_space<vmem>>, vector<8x128xf32>
    tpu.vector_store %arg11[%c0_31, %c0_32], %69 {strides = array<i32>} : memref<8x128xf32, #tpu.memory_space<vmem>>, vector<8x128xf32>,
    return
  }
  func.func @transform_0(%arg0: i32) -> (i32, i32) {
    %c0_i32 = arith.constant 0 : i32
    %c0_i32_0 = arith.constant 0 : i32
    return %arg0, %c0_i32 : i32, i32
  }
  func.func @transform_1(%arg0: i32) -> (i32, i32) {
    %c0_i32 = arith.constant 0 : i32
    %c0_i32_0 = arith.constant 0 : i32
    %c0_i32_1 = arith.constant 0 : i32
    return %c0_i32, %c0_i32_0 : i32, i32
  }
  func.func @transform_2(%arg0: i32) -> (i32, i32) {
    %c0_i32 = arith.constant 0 : i32
    %c0_i32_0 = arith.constant 0 : i32
    %c0_i32_1 = arith.constant 0 : i32
    return %c0_i32, %c0_i32_0 : i32, i32
  }
  func.func @transform_3(%arg0: i32) -> (i32, i32) {
    %c0_i32 = arith.constant 0 : i32
    %c0_i32_0 = arith.constant 0 : i32
    %c0_i32_1 = arith.constant 0 : i32
    return %c0_i32, %c0_i32_0 : i32, i32
  }
  func.func @transform_4(%arg0: i32) -> (i32, i32) {
    %c0_i32 = arith.constant 0 : i32
    %c0_i32_0 = arith.constant 0 : i32
    %c0_i32_1 = arith.constant 0 : i32
    return %c0_i32, %c0_i32_0 : i32, i32
  }
  func.func @transform_5(%arg0: i32) -> (i32, i32) {
    %c0_i32 = arith.constant 0 : i32
    %c0_i32_0 = arith.constant 0 : i32
    %c0_i32_1 = arith.constant 0 : i32
    return %c0_i32, %c0_i32_0 : i32, i32
  }
  func.func @transform_6(%arg0: i32) -> (i32, i32) {
    %c0_i32 = arith.constant 0 : i32
    %c0_i32_0 = arith.constant 0 : i32
    %c0_i32_1 = arith.constant 0 : i32
    return %c0_i32, %c0_i32_0 : i32, i32
  }
  func.func @transform_7(%arg0: i32) -> (i32, i32) {
    %c0_i32 = arith.constant 0 : i32
    %c0_i32_0 = arith.constant 0 : i32
    %c0_i32_1 = arith.constant 0 : i32
    return %c0_i32, %c0_i32_0 : i32, i32
  }
  func.func @transform_8(%arg0: i32) -> (i32, i32) {
    %c0_i32 = arith.constant 0 : i32
    %c0_i32_0 = arith.constant 0 : i32
    %c0_i32_1 = arith.constant 0 : i32
    return %c0_i32, %c0_i32_0 : i32, i32
  }
  func.func @transform_9(%arg0: i32) -> (i32, i32) {
    %c0_i32 = arith.constant 0 : i32
    %c0_i32_0 = arith.constant 0 : i32
    %c0_i32_1 = arith.constant 0 : i32
    return %c0_i32, %c0_i32_0 : i32, i32
  }
  func.func @transform_10(%arg0: i32) -> (i32, i32) {
    %c0_i32 = arith.constant 0 : i32
    %c0_i32_0 = arith.constant 0 : i32
    return %arg0, %c0_i32 : i32, i32
  }
}

</mosaic_0001>

<bundles_post_ra>
// kernel: _lambda_.3
= control target key start
LH: loop header
LB: loop body
LE: loop exit
PB: predicated region body
PF: predicated region fallthrough
CT: control target
= control target key end

     0   :  { %v908_v0 = vmov 0.0   ;;  %vm909_vm0 = vmmov 0   ;;  %v910_v51 = vmov 0   ;;  %s1168_s1 = inlined_call_operand.vmem [shape: bf16[128,128], index: 1, kind: input, shape index: {}]   ;;  %s1169_s2 = inlined_call_operand.vmem [shape: bf16[128,128], index: 2, kind: input, shape index: {}]   ;;  %s1170_s0 = inlined_call_operand.vmem [shape: f32[8,128], index: 0, kind: input, shape index: {}]   ;;  %s1171_s3 = inlined_call_operand.vmem [shape: f32[1,128], index: 3, kind: input, shape index: {}]   ;;  %s1172_s6 = inlined_call_operand.vmem [shape: bf16[128,256], index: 6, kind: input, shape index: {}]   ;;  %s1173_s4 = inlined_call_operand.vmem [shape: f32[1,128], index: 4, kind: input, shape index: {}]   ;;  %s1174_s5 = inlined_call_operand.vmem [shape: f32[1,128], index: 5, kind: input, shape index: {}]   ;;  %s1175_s8 = inlined_call_operand.vmem [shape: bf16[256,128], index: 8, kind: input, shape index: {}]   ;;  %s1176_s7 = inlined_call_operand.vmem [shape: f32[1,256], index: 7, kind: input, shape index: {}]   ;;  %s1177_s9 = inlined_call_operand.vmem [shape: f32[1,128], index: 9, kind: input, shape index: {}]   ;;  %s1178_s10 = inlined_call_operand.vmem [shape: f32[8,128], index: 10, kind: output, shape index: {}]  }
   0x1   :  { %781 = vmatprep.subr.bf16.mxu0 %v908_v0  ;;  %v844_v1 = vld [vmem:[%s1168_s1 + $0x38] sm:$0xff]   ;;  %797 = vmatprep.mubr.msk.bf16.mxu0 %vm909_vm0, %v908_v0  ;;  %v845_v2 = vld [vmem:[%s1168_s1 + $0x30] sm:$0xff]   ;;  %v846_v3 = vld [vmem:[%s1168_s1 + $0x28] sm:$0xff]  }
   0x2   :  { %801 = vmatprep.subr.bf16.mxu1 %v908_v0  ;;  %817 = vmatprep.mubr.msk.bf16.mxu1 %vm909_vm0, %v908_v0  ;;  %v847_v4 = vld [vmem:[%s1168_s1 + $0x20] sm:$0xff]   ;;  %v852_v5 = vld [vmem:[%s1169_s2 + $0x38] sm:$0xff]   ;;  %v849_v7 = vld [vmem:[%s1168_s1 + $0x10] sm:$0xff]  }
   0x3   :  { %782 = vmatpush3.bf16.msra.mxu0 %v844_v1  ;;  %802 = vmatpush3.bf16.msra.mxu1 %v852_v5  ;;  %v848_v6 = vld [vmem:[%s1168_s1 + $0x18] sm:$0xff]   ;;  %v850_v8 = vld [vmem:[%s1168_s1 + $0x8] sm:$0xff]   ;;  %v1005_v9 = vld [vmem:[%s1170_s0] sm:$0xff] }
   0x4   :  { %783 = vmatprep.subr.bf16.mxu0 %v908_v0  ;;  %803 = vmatprep.subr.bf16.mxu1 %v908_v0  ;;  %v53_v10 = vmul.f32 %v1005_v9, %v1005_v9  ;;  %v851_v11 = vld [vmem:[%s1168_s1] sm:$0xff]   ;;  %v853_v13 = vld [vmem:[%s1169_s2 + $0x30] sm:$0xff]   ;;  %v854_v14 = vld [vmem:[%s1169_s2 + $0x28] sm:$0xff]  }
   0x5   :  { %v855_v15 = vld [vmem:[%s1169_s2 + $0x20] sm:$0xff]   ;;  %v856_v16 = vld [vmem:[%s1169_s2 + $0x18] sm:$0xff]   ;;  %v857_v17 = vld [vmem:[%s1169_s2 + $0x10] sm:$0xff]  }
   0x6   :  { %v54_v12 = vpack.c.bf16 %v53_v10, %v1005_v9  ;;  %v858_v18 = vld [vmem:[%s1169_s2 + $0x8] sm:$0xff]   ;;  %v859_v19 = vld [vmem:[%s1169_s2] sm:$0xff]   ;;  %v862_v40 = vld [vmem:[%s1172_s6 + $0x74] ss:$8 sps:$4 sm:$0xff]  }
   0x7   :  { %784 = vmatpush3.bf16.msra.mxu0 %v845_v2  ;;  %804 = vmatpush3.bf16.msra.mxu1 %v853_v13  ;;  %v688_v32 = vld [vmem:[%s1171_s3] ss:$0 sm:$0xff]  ;;  %v860_v41 = vld [vmem:[%s1172_s6 + $0x70] ss:$8 sps:$4 sm:$0xff]   ;;  %v865_v42 = vld [vmem:[%s1172_s6 + $0x64] ss:$8 sps:$4 sm:$0xff]  }
   0x8   :  { %785 = vmatprep.subr.bf16.mxu0 %v908_v0  ;;  %805 = vmatprep.subr.bf16.mxu1 %v908_v0  ;;  %v863_v43 = vld [vmem:[%s1172_s6 + $0x60] ss:$8 sps:$4 sm:$0xff]   ;;  %v868_v44 = vld [vmem:[%s1172_s6 + $0x54] ss:$8 sps:$4 sm:$0xff]   ;;  %v866_v45 = vld [vmem:[%s1172_s6 + $0x50] ss:$8 sps:$4 sm:$0xff]  }
   0x9   :  { %v869_v46 = vld [vmem:[%s1172_s6 + $0x40] ss:$8 sps:$4 sm:$0xff]   ;;  %v871_v47 = vld [vmem:[%s1172_s6 + $0x44] ss:$8 sps:$4 sm:$0xff]   ;;  %v874_v48 = vld [vmem:[%s1172_s6 + $0x34] ss:$8 sps:$4 sm:$0xff]  }
   0xa   :  { %v872_v49 = vld [vmem:[%s1172_s6 + $0x30] ss:$8 sps:$4 sm:$0xff]   ;;  %v877_v50 = vld [vmem:[%s1172_s6 + $0x24] ss:$8 sps:$4 sm:$0xff]   ;;  %v875_v52 = vld [vmem:[%s1172_s6 + $0x20] ss:$8 sps:$4 sm:$0xff]  }
   0xb   :  { %786 = vmatpush3.bf16.msra.mxu0 %v846_v3  ;;  %806 = vmatpush3.bf16.msra.mxu1 %v854_v14  ;;  %v880_v53 = vld [vmem:[%s1172_s6 + $0x14] ss:$8 sps:$4 sm:$0xff]   ;;  %v878_v54 = vld [vmem:[%s1172_s6 + $0x10] ss:$8 sps:$4 sm:$0xff]   ;;  %v883_v55 = vld [vmem:[%s1172_s6 + $0x4] ss:$8 sps:$4 sm:$0xff]  }
   0xc   :  { %787 = vmatprep.subr.bf16.mxu0 %v908_v0  ;;  %807 = vmatprep.subr.bf16.mxu1 %v908_v0  ;;  %v881_v56 = vld [vmem:[%s1172_s6] ss:$8 sps:$4 sm:$0xff]   ;;  %v884_v10 = vld [vmem:[%s1175_s8 + $0x78] sm:$0xff]   ;;  %v887_v13 = vld [vmem:[%s1175_s8 + $0x30] sm:$0xff]  }
   0xd   :  { %v698_v5 = vld [vmem:[%s1174_s5] ss:$0 sm:$0xff]  ;;  %v888_v14 = vld [vmem:[%s1175_s8 + $0x68] sm:$0xff]  }
   0xf   :  { %788 = vmatpush3.bf16.msra.mxu0 %v847_v4  ;;  %808 = vmatpush3.bf16.msra.mxu1 %v855_v15  ;;  %v889_v15 = vld [vmem:[%s1175_s8 + $0x28] sm:$0xff]  }
  0x10   :  { %789 = vmatprep.subr.bf16.mxu0 %v908_v0  ;;  %809 = vmatprep.subr.bf16.mxu1 %v908_v0 }
  0x13   :  { %790 = vmatpush3.bf16.msra.mxu0 %v848_v6  ;;  %810 = vmatpush3.bf16.msra.mxu1 %v856_v16  ;;  %v890_v16 = vld [vmem:[%s1175_s8 + $0x60] sm:$0xff]  }
  0x14   :  { %791 = vmatprep.subr.bf16.mxu0 %v908_v0  ;;  %811 = vmatprep.subr.bf16.mxu1 %v908_v0 }
  0x17   :  { %792 = vmatpush3.bf16.msra.mxu0 %v849_v7  ;;  %812 = vmatpush3.bf16.msra.mxu1 %v857_v17  ;;  %v891_v17 = vld [vmem:[%s1175_s8 + $0x20] sm:$0xff]  }
  0x18   :  { %793 = vmatprep.subr.bf16.mxu0 %v908_v0  ;;  %813 = vmatprep.subr.bf16.mxu1 %v908_v0 }
  0x1b   :  { %794 = vmatpush3.bf16.msra.mxu0 %v850_v8  ;;  %814 = vmatpush3.bf16.msra.mxu1 %v858_v18  ;;  %v892_v18 = vld [vmem:[%s1175_s8 + $0x58] sm:$0xff]  }
  0x1c   :  { %795 = vmatprep.subr.bf16.mxu0 %v908_v0  ;;  %815 = vmatprep.subr.bf16.mxu1 %v908_v0 }
  0x1f   :  { %796 = vmatpush3.bf16.msra.mxu0 %v851_v11  ;;  %816 = vmatpush3.bf16.msra.mxu1 %v859_v19  ;;  %v893_v19 = vld [vmem:[%s1175_s8 + $0x18] sm:$0xff]  }
  0x20   :  { %821 = vmatprep.subr.bf16.mxu0 %v908_v0  ;;  %438 = vmatprep.subr.bf16.mxu1 %v862_v40 }
  0x22   :  { %798 = vmatmul.mubr.bf16.vlgmr.msra.gmra.mxu0 %v54_v12  ;;  %v886_v12 = vld [vmem:[%s1175_s8 + $0x70] sm:$0xff]  }
  0x23   :  { %822 = vmatpush3.bf16.msra.mxu0 %v844_v1  ;;  %837 = vmatprep.mubr.msk.bf16.mxu0 %vm909_vm0, %v908_v0 }
  0x24   :  { %823 = vmatprep.subr.bf16.mxu0 %v908_v0 }
  0x27   :  { %824 = vmatpush3.bf16.msra.mxu0 %v845_v2 }
  0x28   :  { %825 = vmatprep.subr.bf16.mxu0 %v908_v0 }
  0x2b   :  { %826 = vmatpush3.bf16.msra.mxu0 %v846_v3  ;;  %v697_v3 = vld [vmem:[%s1173_s4] ss:$0 sm:$0xff] }
  0x2c   :  { %827 = vmatprep.subr.bf16.mxu0 %v908_v0 }
  0x2f   :  { %828 = vmatpush3.bf16.msra.mxu0 %v847_v4 }
  0x30   :  { %829 = vmatprep.subr.bf16.mxu0 %v908_v0 }
  0x33   :  { %830 = vmatpush3.bf16.msra.mxu0 %v848_v6 }
  0x34   :  { %831 = vmatprep.subr.bf16.mxu0 %v908_v0 }
  0x37   :  { %832 = vmatpush3.bf16.msra.mxu0 %v849_v7 }
  0x38   :  { %833 = vmatprep.subr.bf16.mxu0 %v908_v0 }
  0x3b   :  { %834 = vmatpush3.bf16.msra.mxu0 %v850_v8 }
  0x3c   :  { %835 = vmatprep.subr.bf16.mxu0 %v908_v0 }
  0x3f   :  { %836 = vmatpush3.bf16.msra.mxu0 %v851_v11  ;;  %v885_v11 = vld [vmem:[%s1175_s8 + $0x38] sm:$0xff]  }
  0x40   :  { %759 = vmatprep.subr.bf16.mxu0 %v884_v10 }
  0xe2   :  { %v137_v20 = vpop.f32.mrf.mxu0 }
  0xe3   :  { %v144_v22 = vmul.f32 %v137_v20, %v137_v20  ;;  %v147_v28 = vsub.f32 %v1005_v9, %v137_v20  ;;  %v894_v20 = vld [vmem:[%s1175_s8 + $0x50] sm:$0xff]  }
  0xe4   :  { %v799_v21 = vpop.f32.mrf.mxu0 }
  0xe5   :  { %v895_v21 = vld [vmem:[%s1175_s8 + $0x10] sm:$0xff]  }
  0xe6   :  { %v140_v23 = vpop.f32.mrf.mxu0 }
  0xe7   :  { %v145_v24 = vsub.f32 %v140_v23, %v144_v22  ;;  %v896_v22 = vld [vmem:[%s1175_s8 + $0x48] sm:$0xff]  }
  0xe8   :  { %v800_v25 = vpop.f32.mrf.mxu0  ;;  %v897_v23 = vld [vmem:[%s1175_s8 + $0x8] sm:$0xff]  }
  0xe9   :  { %v146_v26 = vmax.f32 %v145_v24, 0.0  ;;  %v898_v24 = vld [vmem:[%s1175_s8 + $0x40] sm:$0xff]  }
  0xea   :  { %v899_v25 = vld [vmem:[%s1175_s8] sm:$0xff]  }
  0xeb   :  { %v148_v27 = vadd.f32 1e-06, %v146_v26  ;;  %v348_v26 = vlaneseq }
  0xed   :  { %900 = vrsqrt.f32 %v148_v27  ;;  %v349_v27 = vshrl.u32 %v348_v26, 7 }
  0xfa   :  { %v901_v29 = vpop.eup %900 }
  0xfb   :  { %v150_v30 = vmul.f32 %v901_v29, %v147_v28  ;;  %v350_v28 = vsub.s32 0, %v349_v27  ;;  %v346_v29 = vld [vmem:[%s1176_s7] sm:$0x3] }
  0xfd   :  { %v151_v31 = vpack.c.bf16 %v150_v30, %v150_v30  ;;  %v354_v30 = vsub.s32 1, %v349_v27 }
  0xff   :  { %818 = vmatmul.mubr.bf16.vlgmr.msra.gmra.mxu1 %v151_v31  ;;  %v351_v31 = vrot.slane %v346_v29, %v350_v28 }
 0x100   :  { %439 = vmatpush1.bf16.msra.mxu1 %v860_v41  ;;  %470 = vmatprep.mubr.bf16.mxu1 %v910_v51 }
 0x101   :  { %440 = vmatprep.subr.bf16.mxu1 %v865_v42 }
 0x104   :  { %441 = vmatpush1.bf16.msra.mxu1 %v863_v43 }
 0x105   :  { %442 = vmatprep.subr.bf16.mxu1 %v868_v44 }
 0x108   :  { %443 = vmatpush1.bf16.msra.mxu1 %v866_v45 }
 0x109   :  { %444 = vmatprep.subr.bf16.mxu1 %v871_v47 }
 0x10c   :  { %445 = vmatpush1.bf16.msra.mxu1 %v869_v46 }
 0x10d   :  { %446 = vmatprep.subr.bf16.mxu1 %v874_v48 }
 0x110   :  { %447 = vmatpush1.bf16.msra.mxu1 %v872_v49 }
 0x111   :  { %448 = vmatprep.subr.bf16.mxu1 %v877_v50 }
 0x114   :  { %449 = vmatpush1.bf16.msra.mxu1 %v875_v52 }
 0x115   :  { %450 = vmatprep.subr.bf16.mxu1 %v880_v53 }
 0x118   :  { %451 = vmatpush1.bf16.msra.mxu1 %v878_v54 }
 0x119   :  { %452 = vmatprep.subr.bf16.mxu1 %v883_v55 }
 0x11c   :  { %453 = vmatpush1.bf16.msra.mxu1 %v881_v56 }
 0x1bf   :  { %v257_v33 = vpop.f32.mrf.mxu1 }
 0x1c0   :  { %v258_v34 = vadd.f32 %v688_v32, %v257_v33  ;;  %v355_v32 = vrot.slane %v346_v29, %v354_v30 }
 0x1c1   :  { %v819_v35 = vpop.f32.mrf.mxu1 }
 0x1c2   :  { %v263_v36 = vmul.f32 %v258_v34, %v258_v34 }
 0x1c3   :  { %v260_v37 = vpop.f32.mrf.mxu1 }
 0x1c4   :  { %v264_v38 = vpack.c.bf16 %v263_v36, %v258_v34 }
 0x1c5   :  { %v820_v39 = vpop.f32.mrf.mxu1 }
 0x1c6   :  { %838 = vmatmul.mubr.bf16.vlgmr.msra.gmra.mxu0 %v264_v38 }
 0x1c7   :  { %760 = vmatpush3.bf16.msra.mxu0 %v885_v11 }
 0x1c8   :  { %761 = vmatprep.subr.bf16.mxu0 %v886_v12 }
 0x1cb   :  { %762 = vmatpush3.bf16.msra.mxu0 %v887_v13 }
 0x1cc   :  { %763 = vmatprep.subr.bf16.mxu0 %v888_v14 }
 0x1cf   :  { %764 = vmatpush3.bf16.msra.mxu0 %v889_v15 }
 0x1d0   :  { %765 = vmatprep.subr.bf16.mxu0 %v890_v16 }
 0x1d3   :  { %766 = vmatpush3.bf16.msra.mxu0 %v891_v17 }
 0x1d4   :  { %767 = vmatprep.subr.bf16.mxu0 %v892_v18 }
 0x1d7   :  { %768 = vmatpush3.bf16.msra.mxu0 %v893_v19 }
 0x1d8   :  { %769 = vmatprep.subr.bf16.mxu0 %v894_v20 }
 0x1db   :  { %770 = vmatpush3.bf16.msra.mxu0 %v895_v21 }
 0x1dc   :  { %771 = vmatprep.subr.bf16.mxu0 %v896_v22 }
 0x1df   :  { %772 = vmatpush3.bf16.msra.mxu0 %v897_v23 }
 0x1e0   :  { %773 = vmatprep.subr.bf16.mxu0 %v898_v24 }
 0x1e3   :  { %774 = vmatpush3.bf16.msra.mxu0 %v899_v25 }
 0x286   :  { %v299_v57 = vpop.f32.mrf.mxu0 }
 0x287   :  { %v306_v59 = vmul.f32 %v299_v57, %v299_v57  ;;  %v309_v1 = vsub.f32 %v258_v34, %v299_v57 }
 0x288   :  { %v839_v58 = vpop.f32.mrf.mxu0 }
 0x28a   :  { %v302_v60 = vpop.f32.mrf.mxu0 }
 0x28b   :  { %v307_v61 = vsub.f32 %v302_v60, %v306_v59  ;;  %v715_v60 = vld [vmem:[%s1177_s9] ss:$0 sm:$0xff] }
 0x28c   :  { %v840_v62 = vpop.f32.mrf.mxu0 }
 0x28d   :  { %v308_v63 = vmax.f32 %v307_v61, 0.0 }
 0x28f   :  { %v310_v0 = vadd.f32 1e-06, %v308_v63 }
 0x291   :  { %902 = vrsqrt.f32 %v310_v0 }
 0x29e   :  { %v903_v2 = vpop.eup %902 }
 0x29f   :  { %v312_v4 = vmul.f32 %v903_v2, %v309_v1 }
 0x2a1   :  { %v320_v6 = vmul.f32 %v697_v3, %v312_v4 }
 0x2a3   :  { %v328_v7 = vadd.f32 %v698_v5, %v320_v6 }
 0x2a5   :  { %v329_v8 = vpack.c.bf16 %v328_v7, %v328_v7 }
 0x2a7   :  { %471 = vmatmul.mubr.bf16.vlgmr.msra.gmra.mxu1 %v329_v8 }
 0x367   :  { %v472_v33 = vpop.f32.mrf.mxu1 }
 0x368   :  { %v473_v34 = vadd.f32 %v472_v33, %v351_v31 }
 0x369   :  { %v474_v35 = vpop.f32.mrf.mxu1 }
 0x36a   :  { %v481_v36 = vmul.f32 0.044715, %v473_v34  ;;  %v475_v37 = vadd.f32 %v474_v35, %v355_v32  ;;  %v479_v52 = vmul.f32 0.5, %v473_v34 }
 0x36b   :  { %v476_v38 = vpop.f32.mrf.mxu1 }
 0x36c   :  { %v483_v39 = vmul.f32 %v481_v36, %v473_v34  ;;  %v482_v40 = vmul.f32 0.044715, %v475_v37  ;;  %v480_v53 = vmul.f32 0.5, %v475_v37 }
 0x36d   :  { %v477_v41 = vpop.f32.mrf.mxu1 }
 0x36e   :  { %v485_v42 = vmul.f32 %v483_v39, %v473_v34  ;;  %v484_v43 = vmul.f32 %v482_v40, %v475_v37 }
 0x370   :  { %v487_v44 = vadd.f32 %v485_v42, %v473_v34  ;;  %v486_v45 = vmul.f32 %v484_v43, %v475_v37 }
 0x372   :  { %v489_v46 = vmul.f32 0.7978846, %v487_v44  ;;  %v488_v47 = vadd.f32 %v486_v45, %v475_v37 }
 0x374   :  { %v490_v48 = vmul.f32 0.7978846, %v488_v47  ;;  %904 = vtanh.f32 %v489_v46 }
 0x376   :  { %906 = vtanh.f32 %v490_v48 }
 0x381   :  { %v905_v49 = vpop.eup %904 }
 0x382   :  { %v493_v50 = vadd.f32 1.0, %v905_v49 }
 0x383   :  { %v907_v51 = vpop.eup %906 }
 0x384   :  { %v494_v54 = vadd.f32 1.0, %v907_v51  ;;  %v495_v55 = vmul.f32 %v493_v50, %v479_v52 }
 0x386   :  { %v496_v56 = vmul.f32 %v494_v54, %v480_v53  ;;  %v497_v58 = vpack.c.bf16 %v495_v55, %v495_v55 }
 0x388   :  { %v498_v57 = vpack.c.bf16 %v496_v56, %v496_v56 }
 0x38a   :  { %666 = vmatprep.mubr.bf16.mxu0 %v498_v57 }
 0x38b   :  { %667 = vmatmul.mubr.bf16.vlgmr.msra.gmra.mxu0 %v497_v58 }
 0x44b   :  { %v775_v59 = vpop.f32.mrf.mxu0 }
 0x44d   :  { %v776_v61 = vpop.f32.mrf.mxu0 }
 0x44e   :  { %v777_v62 = vadd.f32 %v776_v61, %v775_v59 }
 0x44f   :  { %v778_v63 = vpop.f32.mrf.mxu0 }
 0x450   :  { %v669_v0 = vadd.f32 %v777_v62, %v715_v60 }
 0x451   :  { %v779_v1 = vpop.f32.mrf.mxu0 }
 0x452   :  { %v674_v2 = vadd.f32 %v669_v0, %v1005_v9 }
 0x454   :  { %675 = vst [vmem:[%s1178_s10] sm:$0xff] %v674_v2 }

// kernel: _lambda_.2
= control target key start
LH: loop header
LB: loop body
LE: loop exit
PB: predicated region body
PF: predicated region fallthrough
CT: control target
= control target key end

     0   :  { %15 = vsyncpa [#allocation3], 0  ;;  %s3141_s0 = inlined_call_operand.vmem [shape: f32[16,256], index: 0, kind: input, shape index: {}]   ;;  %s3142_s1 = inlined_call_operand.vmem [shape: bf16[256,256], index: 1, kind: input, shape index: {}]   ;;  %s3143_s2 = inlined_call_operand.hbm [shape: bf16[256,256], index: 2, kind: input, shape index: {}]   ;;  %s3144_s3 = inlined_call_operand.vmem [shape: f32[1,256], index: 3, kind: input, shape index: {}]   ;;  %s3145_s4 = inlined_call_operand.vmem [shape: f32[1,256], index: 4, kind: input, shape index: {}]   ;;  %s3146_s5 = inlined_call_operand.vmem [shape: f32[1,256], index: 5, kind: input, shape index: {}]   ;;  %s3147_s6 = inlined_call_operand.hbm [shape: bf16[256,512], index: 6, kind: input, shape index: {}]   ;;  %s3148_s7 = inlined_call_operand.vmem [shape: f32[1,512], index: 7, kind: input, shape index: {}]   ;;  %s3149_s8 = inlined_call_operand.hbm [shape: bf16[512,256], index: 8, kind: input, shape index: {}]   ;;  %s3150_s9 = inlined_call_operand.vmem [shape: f32[1,256], index: 9, kind: input, shape index: {}]   ;;  %s3151_s10 = inlined_call_operand.vmem [shape: f32[16,256], index: 10, kind: output, shape index: {}]  }
   0x1   :  { %16 = vsyncpa [#allocation5], 0  ;;  %s2809_s13 = smov 0  }
   0x2 LB: > { %s2747_s14 = smov [#allocation4]   ;;  %s2815_s16 = sadd.s32 4294967295, %s2745_s13   ;;  %s2745_s13 = sphi %s2809_s13, %s22_s13  }
   0x3   : > { %s305_s15 = sshll.u32 %s2747_s14, 4  ;;  %p2095_p0 = scmp.ge.s32.totalorder %s2745_s13, 1  ;;  %s306_s15 = int_to_ptr.vmem [resolvable:$true] %s305_s15 }
   0x4   : > { %p268_p1 = scmp.lt.s32.totalorder %s2745_s13, 3  ;;  %p2326_p2 = scmp.eq.s32.totalorder %s2815_s16, 0 }
   0x5   : > { %s2748_s18 = smov [#allocation2]   ;;  %s2749_s21 = smov [#allocation6]  }
   0x6   : > { %p2820_p3 = pnand %p2095_p0, %p268_p1  ;;  %s283_s19 = sshll.u32 %s2748_s18, 4  ;;  %s2826_s19 = int_to_ptr.vmem [resolvable:$true] %s283_s19 }
   0x7   : > { %s2834_s22 = sshll.u32 %s2749_s21, 4  ;;  %s2664_s23 = scalar_lea.vmem %s306_s15, 8192  ;;  %s322_s22 = int_to_ptr.vmem [resolvable:$true] %s2834_s22 }
   0x8   : > { %p2316_p4 = pneg %p2820_p3  ;;  %p2665_p7 = scmp.ne.s32.totalorder %s306_s15, %s2664_s23 }
   0x9   : > { %p2672_p10 = scmp.lt.s32.totalorder %s306_s15, %s306_s15  ;;  %p2673_p11 = scmp.lt.s32.totalorder %s2664_s23, %s2664_s23 }
   0xa   : > { %p2830_p5 = pnand %p2326_p2, %p2316_p4 }
   0xb   : > { %p2674_p12 = por %p2673_p11, %p2672_p10 }
   0xc   : > { %p2655_p6 = pneg %p2830_p5 }
   0xe   : > { %p2667_p8 = pnand %p2665_p7, %p2655_p6 }
  0x10   : > { %p2668_p9 = pneg %p2667_p8 }
  0x12   : > { %p2675_p13 = pnand %p2674_p12, %p2668_p9 }
  0x14   : > { %2678 = shalt.err (!%p2675_p13)
}
  0x15   : > { %s2750_s24 = smov 256   ;;  %s2751_s25 = smov 16  }
  0x16   : > { %2322 = dma.hbm_to_vmem [thread:$0]  (!%p2830_p5), %s3147_s6, 8192, %s306_s15, [#allocation5], %s2750_s24, %s2750_s24, %s2751_s25  }
  0x17   : > { %s2690_s28 = scalar_lea.vmem %s2826_s19, 4096  ;;  %p2698_p7 = scmp.lt.s32.totalorder %s2826_s19, %s2826_s19 }
  0x18   : > { %p2691_p0 = scmp.ne.s32.totalorder %s2826_s19, %s2690_s28  ;;  %p2699_p8 = scmp.lt.s32.totalorder %s2690_s28, %s2690_s28 }
  0x1a   : > { %p2693_p1 = pnand %p2691_p0, %p2655_p6  ;;  %p2700_p9 = por %p2699_p8, %p2698_p7 }
  0x1c   : > { %p2694_p4 = pneg %p2693_p1 }
  0x1e   : > { %p2701_p10 = pnand %p2700_p9, %p2694_p4 }
  0x20   : > { %2704 = shalt.err (!%p2701_p10)
}
  0x21   : > { %s2752_s29 = smov 128   ;;  %s2753_s30 = smov 8  }
  0x22   : > { %2319 = dma.hbm_to_vmem [thread:$0]  (!%p2830_p5), %s3143_s2, 4096, %s2826_s19, [#allocation3], %s2752_s29, %s2752_s29, %s2753_s30  }
  0x23   : > { %s2716_s14 = scalar_lea.vmem %s322_s22, 8192  ;;  %p2724_p0 = scmp.lt.s32.totalorder %s322_s22, %s322_s22 }
  0x24   : > { %p2717_p11 = scmp.ne.s32.totalorder %s322_s22, %s2716_s14  ;;  %p2725_p1 = scmp.lt.s32.totalorder %s2716_s14, %s2716_s14 }
  0x26   : > { %p2719_p12 = pnand %p2717_p11, %p2655_p6  ;;  %p2726_p4 = por %p2725_p1, %p2724_p0 }
  0x28   : > { %p2720_p13 = pneg %p2719_p12 }
  0x2a   : > { %p2727_p7 = pnand %p2726_p4, %p2720_p13 }
  0x2c   : > { %2730 = shalt.err (!%p2727_p7)
}
  0x2d   : > { %2325 = dma.hbm_to_vmem [thread:$0]  (!%p2830_p5), %s3149_s8, 8192, %s322_s22, [#allocation5], %s2752_s29, %s2752_s29, %s2753_s30  }
  0x2e   : > { %348 = sbr.rel (%p2820_p3) target bundleno = 1203 (0x4b3), region = 60 }
  0x33   : > { %2736 = dma.done.wait (%p2326_p2), [#allocation3], 4096  }
  0x34   : > { %2738 = vsyncadd (%p2326_p2), [#allocation3], 4294963200 }
  0x35   : > { %2740 = dma.done.wait (%p2326_p2), [#allocation5], 16384  }
  0x36   : > { %2742 = vsyncadd (%p2326_p2), [#allocation5], 4294950912  ;;  %v2881_v0 = vld [vmem:[%s3142_s1 + $0x74] ss:$8 sps:$4 sm:$0xff]   ;;  %v2886_v1 = vld [vmem:[%s3142_s1 + $0x70] ss:$8 sps:$4 sm:$0xff]  }
  0x37   : > { %602 = vmatprep.subr.bf16.mxu0 %v2881_v0  ;;  %v2892_v2 = vld [vmem:[%s3142_s1 + $0x64] ss:$8 sps:$4 sm:$0xff]   ;;  %v2898_v3 = vld [vmem:[%s3142_s1 + $0x60] ss:$8 sps:$4 sm:$0xff]   ;;  %v2904_v4 = vld [vmem:[%s3142_s1 + $0x54] ss:$8 sps:$4 sm:$0xff]  }
  0x38   : > { %603 = vmatpush1.bf16.msra.mxu0 %v2886_v1  ;;  %v2910_v5 = vld [vmem:[%s3142_s1 + $0x50] ss:$8 sps:$4 sm:$0xff]   ;;  %p394_p2 = scmp.lt.s32.totalorder %s2815_s16, 1  ;;  %v2917_v6 = vld [vmem:[%s3142_s1 + $0x44] ss:$8 sps:$4 sm:$0xff]  }
  0x39   : > { %604 = vmatprep.subr.bf16.mxu0 %v2892_v2  ;;  %v2923_v7 = vld [vmem:[%s3142_s1 + $0x40] ss:$8 sps:$4 sm:$0xff]   ;;  %v2932_v8 = vld [vmem:[%s3142_s1 + $0x34] ss:$8 sps:$4 sm:$0xff]   ;;  %v2938_v9 = vld [vmem:[%s3142_s1 + $0x30] ss:$8 sps:$4 sm:$0xff]  }
  0x3a   : > { %s3155_s16 = smov (!%p394_p2, %s2815_s16), 1  ;;  %v2945_v10 = vld [vmem:[%s3142_s1 + $0x24] ss:$8 sps:$4 sm:$0xff]   ;;  %v2958_v11 = vld [vmem:[%s3142_s1 + $0x20] ss:$8 sps:$4 sm:$0xff]  }
  0x3b   : > { %s2302_s17 = sshll.u32 %s3155_s16, 4  ;;  %v2964_v12 = vld [vmem:[%s3142_s1 + $0x14] ss:$8 sps:$4 sm:$0xff]   ;;  %v2969_v13 = vld [vmem:[%s3142_s1 + $0x10] ss:$8 sps:$4 sm:$0xff]  }
  0x3c   : > { %605 = vmatpush1.bf16.msra.mxu0 %v2898_v3  ;;  %s2952_s25 = scalar_lea.vmem %s3141_s0, %s2302_s17  ;;  %v2395_v16 = vld [vmem:[#allocation2 + $0x74] ss:$8 sps:$4 sm:$0xff]   ;;  %v2397_v17 = vld [vmem:[#allocation2 + $0x70] ss:$8 sps:$4 sm:$0xff]   ;;  %v2981_v18 = vld [vmem:[%s3142_s1 + $0x4] ss:$8 sps:$4 sm:$0xff]   ;;  %s403_s12 = scalar_lea.vmem %s3151_s10, %s2302_s17 }
  0x3d   : > { %606 = vmatprep.subr.bf16.mxu0 %v2904_v4  ;;  %v2972_v14 = vld [vmem:[%s2952_s25 + $0x8] sm:$0xff]  ;;  %865 = vmatprep.subr.bf16.mxu1 %v2395_v16  ;;  %v2401_v22 = vld [vmem:[#allocation2 + $0x54] ss:$8 sps:$4 sm:$0xff]   ;;  %v2999_v25 = vld [vmem:[%s3142_s1 + $0xf0] ss:$8 sps:$4 sm:$0xff]  }
  0x3e   : > { %v439_v15 = vmul.f32 %v2972_v14, %v2972_v14  ;;  %v2398_v20 = vld [vmem:[#allocation2 + $0x64] ss:$8 sps:$4 sm:$0xff]   ;;  %866 = vmatpush1.bf16.msra.mxu1 %v2397_v17  ;;  %v2400_v21 = vld [vmem:[#allocation2 + $0x60] ss:$8 sps:$4 sm:$0xff]   ;;  %v2994_v24 = vld [vmem:[%s3142_s1 + $0xf4] ss:$8 sps:$4 sm:$0xff]  }
  0x3f   : > { %867 = vmatprep.subr.bf16.mxu1 %v2398_v20  ;;  %v2988_v23 = vld [vmem:[%s3142_s1] ss:$8 sps:$4 sm:$0xff]   ;;  %v2403_v26 = vld [vmem:[#allocation2 + $0x50] ss:$8 sps:$4 sm:$0xff]   ;;  %v2404_v27 = vld [vmem:[#allocation2 + $0x44] ss:$8 sps:$4 sm:$0xff]  }
  0x40   : > { %607 = vmatpush1.bf16.msra.mxu0 %v2910_v5  ;;  %v441_v19 = vpack.c.bf16 %v439_v15, %v2972_v14  ;;  %v3005_v28 = vld [vmem:[%s3142_s1 + $0xe4] ss:$8 sps:$4 sm:$0xff]   ;;  %v2406_v29 = vld [vmem:[#allocation2 + $0x40] ss:$8 sps:$4 sm:$0xff]   ;;  %v2407_v30 = vld [vmem:[#allocation2 + $0x34] ss:$8 sps:$4 sm:$0xff]  }
  0x41   : > { %608 = vmatprep.subr.bf16.mxu0 %v2917_v6  ;;  %v3011_v31 = vld [vmem:[%s3142_s1 + $0xe0] ss:$8 sps:$4 sm:$0xff]   ;;  %v3016_v32 = vld [vmem:[%s3142_s1 + $0xd4] ss:$8 sps:$4 sm:$0xff]   ;;  %v2409_v33 = vld [vmem:[#allocation2 + $0x30] ss:$8 sps:$4 sm:$0xff]  }
  0x42   : > { %634 = vmatprep.mubr.bf16.mxu0 %v441_v19  ;;  %868 = vmatpush1.bf16.msra.mxu1 %v2400_v21  ;;  %v2410_v34 = vld [vmem:[#allocation2 + $0x24] ss:$8 sps:$4 sm:$0xff]   ;;  %v2379_v35 = vld [vmem:[%s3142_s1 + $0xd0] ss:$8 sps:$4 sm:$0xff]   ;;  %v2412_v37 = vld [vmem:[#allocation2 + $0x20] ss:$8 sps:$4 sm:$0xff]  }
  0x43   : > { %869 = vmatprep.subr.bf16.mxu1 %v2401_v22  ;;  %v2380_v36 = vld [vmem:[%s3142_s1 + $0xc4] ss:$8 sps:$4 sm:$0xff]   ;;  %v2413_v38 = vld [vmem:[#allocation2 + $0x14] ss:$8 sps:$4 sm:$0xff]   ;;  %v2382_v39 = vld [vmem:[%s3142_s1 + $0xc0] ss:$8 sps:$4 sm:$0xff]  }
  0x44   : > { %609 = vmatpush1.bf16.msra.mxu0 %v2923_v7  ;;  %v2383_v40 = vld [vmem:[%s3142_s1 + $0xb4] ss:$8 sps:$4 sm:$0xff]   ;;  %v2415_v41 = vld [vmem:[#allocation2 + $0x10] ss:$8 sps:$4 sm:$0xff]   ;;  %v2416_v42 = vld [vmem:[#allocation2 + $0x4] ss:$8 sps:$4 sm:$0xff]  }
  0x45   : > { %610 = vmatprep.subr.bf16.mxu0 %v2932_v8  ;;  %v2385_v43 = vld [vmem:[%s3142_s1 + $0xb0] ss:$8 sps:$4 sm:$0xff]   ;;  %v2386_v44 = vld [vmem:[%s3142_s1 + $0xa4] ss:$8 sps:$4 sm:$0xff]   ;;  %v2418_v45 = vld [vmem:[#allocation2] ss:$8 sps:$4 sm:$0xff]  }
  0x46   : > { %870 = vmatpush1.bf16.msra.mxu1 %v2403_v26  ;;  %v2388_v46 = vld [vmem:[%s3142_s1 + $0xa0] ss:$8 sps:$4 sm:$0xff]   ;;  %v2389_v47 = vld [vmem:[%s3142_s1 + $0x94] ss:$8 sps:$4 sm:$0xff]   ;;  %v2391_v48 = vld [vmem:[%s3142_s1 + $0x90] ss:$8 sps:$4 sm:$0xff]  }
  0x47   : > { %871 = vmatprep.subr.bf16.mxu1 %v2404_v27  ;;  %v3050_v49 = vld [vmem:[%s2952_s25] sm:$0xff]  ;;  %v2419_v54 = vld [vmem:[#allocation2 + $0xf4] ss:$8 sps:$4 sm:$0xff]   ;;  %v2421_v55 = vld [vmem:[#allocation2 + $0xf0] ss:$8 sps:$4 sm:$0xff]  }
  0x48   : > { %611 = vmatpush1.bf16.msra.mxu0 %v2938_v9  ;;  %v2392_v50 = vld [vmem:[%s3142_s1 + $0x84] ss:$8 sps:$4 sm:$0xff]   ;;  %v2394_v51 = vld [vmem:[%s3142_s1 + $0x80] ss:$8 sps:$4 sm:$0xff]   ;;  %v438_v52 = vmul.f32 %v3050_v49, %v3050_v49  ;;  %v2425_v58 = vld [vmem:[#allocation2 + $0xd4] ss:$8 sps:$4 sm:$0xff]  }
  0x49   : > { %612 = vmatprep.subr.bf16.mxu0 %v2945_v10  ;;  %v2422_v56 = vld [vmem:[#allocation2 + $0xe4] ss:$8 sps:$4 sm:$0xff]   ;;  %v2424_v57 = vld [vmem:[#allocation2 + $0xe0] ss:$8 sps:$4 sm:$0xff]   ;;  %v2427_v59 = vld [vmem:[#allocation2 + $0xd0] ss:$8 sps:$4 sm:$0xff]  }
  0x4a   : > { %872 = vmatpush1.bf16.msra.mxu1 %v2406_v29  ;;  %v440_v53 = vpack.c.bf16 %v438_v52, %v3050_v49  ;;  %v2428_v60 = vld [vmem:[#allocation2 + $0xc4] ss:$8 sps:$4 sm:$0xff]   ;;  %v2430_v61 = vld [vmem:[#allocation2 + $0xc0] ss:$8 sps:$4 sm:$0xff]   ;;  %v2431_v62 = vld [vmem:[#allocation2 + $0xb4] ss:$8 sps:$4 sm:$0xff]  }
  0x4b   : > { %873 = vmatprep.subr.bf16.mxu1 %v2407_v30  ;;  %v2433_v63 = vld [vmem:[#allocation2 + $0xb0] ss:$8 sps:$4 sm:$0xff]   ;;  %v2448_v29 = vld [vmem:[#allocation4 + $0xec] ss:$16 sps:$4 sm:$0xff]   ;;  %v2451_v30 = vld [vmem:[#allocation4 + $0xc4] ss:$16 sps:$4 sm:$0xff]  }
  0x4c   : > { %613 = vmatpush1.bf16.msra.mxu0 %v2958_v11  ;;  %v2443_v27 = vld [vmem:[#allocation4 + $0xe0] ss:$16 sps:$4 sm:$0xff]  }
  0x4d   : > { %614 = vmatprep.subr.bf16.mxu0 %v2964_v12 }
  0x4e   : > { %874 = vmatpush1.bf16.msra.mxu1 %v2409_v33  ;;  %v2455_v33 = vld [vmem:[#allocation4 + $0xa0] ss:$16 sps:$4 sm:$0xff]  }
  0x4f   : > { %875 = vmatprep.subr.bf16.mxu1 %v2410_v34  ;;  %v2461_v34 = vld [vmem:[#allocation4 + $0x80] ss:$16 sps:$4 sm:$0xff]  }
  0x50   : > { %615 = vmatpush1.bf16.msra.mxu0 %v2969_v13 }
  0x51   : > { %616 = vmatprep.subr.bf16.mxu0 %v2981_v18 }
  0x52   : > { %876 = vmatpush1.bf16.msra.mxu1 %v2412_v37  ;;  %v2475_v37 = vld [vmem:[#allocation4 + $0x44] ss:$16 sps:$4 sm:$0xff]  }
  0x53   : > { %877 = vmatprep.subr.bf16.mxu1 %v2413_v38  ;;  %v2473_v38 = vld [vmem:[#allocation4 + $0x40] ss:$16 sps:$4 sm:$0xff]  }
  0x54   : > { %617 = vmatpush1.bf16.msra.mxu0 %v2988_v23 }
  0x55   : > { %618 = vmatprep.subr.bf16.mxu0 %v2994_v24 }
  0x56   : > { %878 = vmatpush1.bf16.msra.mxu1 %v2415_v41  ;;  %v695_v41 = vlaneseq }
  0x57   : > { %879 = vmatprep.subr.bf16.mxu1 %v2416_v42 }
  0x58   : > { %619 = vmatpush2.bf16.msra.mxu0 %v2999_v25  ;;  %v3084_v42 = vshrl.u32 %v695_v41, 7  ;;  %v2533_v41 = vld [vmem:[#allocation4 + $0x100] ss:$16 sps:$4 sm:$0xff]  }
  0x59   : > { %620 = vmatprep.subr.bf16.mxu0 %v3005_v28 }
  0x5a   : > { %880 = vmatpush1.bf16.msra.mxu1 %v2418_v45  ;;  %v3093_v45 = vsub.s32 1, %v3084_v42 }
  0x5b   : > { %881 = vmatprep.subr.bf16.mxu1 %v2419_v54 }
  0x5c   : > { %621 = vmatpush2.bf16.msra.mxu0 %v3011_v31 }
  0x5d   : > { %622 = vmatprep.subr.bf16.mxu0 %v3016_v32 }
  0x5e   : > { %882 = vmatpush2.bf16.msra.mxu1 %v2421_v55 }
  0x5f   : > { %883 = vmatprep.subr.bf16.mxu1 %v2422_v56 }
  0x60   : > { %623 = vmatpush2.bf16.msra.mxu0 %v2379_v35 }
  0x61   : > { %624 = vmatprep.subr.bf16.mxu0 %v2380_v36 }
  0x62   : > { %884 = vmatpush2.bf16.msra.mxu1 %v2424_v57  ;;  %v2446_v57 = vld [vmem:[#allocation4 + $0xe8] ss:$16 sps:$4 sm:$0xff]  }
  0x63   : > { %885 = vmatprep.subr.bf16.mxu1 %v2425_v58 }
  0x64   : > { %625 = vmatpush2.bf16.msra.mxu0 %v2382_v39 }
  0x65   : > { %626 = vmatprep.subr.bf16.mxu0 %v2383_v40 }
  0x66   : > { %886 = vmatpush2.bf16.msra.mxu1 %v2427_v59  ;;  %v2454_v59 = vld [vmem:[#allocation4 + $0xcc] ss:$16 sps:$4 sm:$0xff]  }
  0x67   : > { %887 = vmatprep.subr.bf16.mxu1 %v2428_v60  ;;  %v2452_v60 = vld [vmem:[#allocation4 + $0xc8] ss:$16 sps:$4 sm:$0xff]  }
  0x68   : > { %627 = vmatpush2.bf16.msra.mxu0 %v2385_v43 }
  0x69   : > { %628 = vmatprep.subr.bf16.mxu0 %v2386_v44 }
  0x6a   : > { %888 = vmatpush2.bf16.msra.mxu1 %v2430_v61  ;;  %v2460_v61 = vld [vmem:[#allocation4 + $0xac] ss:$16 sps:$4 sm:$0xff]  }
  0x6b   : > { %889 = vmatprep.subr.bf16.mxu1 %v2431_v62  ;;  %v2458_v62 = vld [vmem:[#allocation4 + $0xa8] ss:$16 sps:$4 sm:$0xff]  }
  0x6c   : > { %629 = vmatpush2.bf16.msra.mxu0 %v2388_v46 }
  0x6d   : > { %630 = vmatprep.subr.bf16.mxu0 %v2389_v47 }
  0x6e   : > { %890 = vmatpush2.bf16.msra.mxu1 %v2433_v63  ;;  %v2466_v63 = vld [vmem:[#allocation4 + $0x8c] ss:$16 sps:$4 sm:$0xff]  }
  0x70   : > { %631 = vmatpush2.bf16.msra.mxu0 %v2391_v48 }
  0x71   : > { %632 = vmatprep.subr.bf16.mxu0 %v2392_v50 }
  0x74   : > { %633 = vmatpush2.bf16.msra.mxu0 %v2394_v51 }
  0x75   : > { %910 = vmatprep.subr.bf16.mxu0 %v2881_v0  ;;  %v2434_v0 = vld [vmem:[#allocation2 + $0xa4] ss:$8 sps:$4 sm:$0xff]  }
  0x76   : > { %891 = vmatprep.subr.bf16.mxu1 %v2434_v0  ;;  %v2464_v0 = vld [vmem:[#allocation4 + $0x88] ss:$16 sps:$4 sm:$0xff]  }
  0x77   : > { %635 = vmatmul.mubr.bf16.vlgmr.msra.gmra.mxu0 %v440_v53 }
  0x78   : > { %911 = vmatpush1.bf16.msra.mxu0 %v2886_v1  ;;  %v2436_v1 = vld [vmem:[#allocation2 + $0xa0] ss:$8 sps:$4 sm:$0xff]  }
  0x79   : > { %912 = vmatprep.subr.bf16.mxu0 %v2892_v2  ;;  %v2437_v2 = vld [vmem:[#allocation2 + $0x94] ss:$8 sps:$4 sm:$0xff]   ;;  %892 = vmatpush2.bf16.msra.mxu1 %v2436_v1 }
  0x7a   : > { %893 = vmatprep.subr.bf16.mxu1 %v2437_v2  ;;  %v2472_v1 = vld [vmem:[#allocation4 + $0x6c] ss:$16 sps:$4 sm:$0xff]   ;;  %v2470_v2 = vld [vmem:[#allocation4 + $0x68] ss:$16 sps:$4 sm:$0xff]  }
  0x7c   : > { %913 = vmatpush1.bf16.msra.mxu0 %v2898_v3  ;;  %v2439_v3 = vld [vmem:[#allocation2 + $0x90] ss:$8 sps:$4 sm:$0xff]  }
  0x7d   : > { %914 = vmatprep.subr.bf16.mxu0 %v2904_v4  ;;  %v2440_v4 = vld [vmem:[#allocation2 + $0x84] ss:$8 sps:$4 sm:$0xff]   ;;  %894 = vmatpush2.bf16.msra.mxu1 %v2439_v3 }
  0x7e   : > { %895 = vmatprep.subr.bf16.mxu1 %v2440_v4  ;;  %v2478_v3 = vld [vmem:[#allocation4 + $0x4c] ss:$16 sps:$4 sm:$0xff]   ;;  %v2476_v4 = vld [vmem:[#allocation4 + $0x48] ss:$16 sps:$4 sm:$0xff]  }
  0x80   : > { %915 = vmatpush1.bf16.msra.mxu0 %v2910_v5  ;;  %v2442_v5 = vld [vmem:[#allocation2 + $0x80] ss:$8 sps:$4 sm:$0xff]  }
  0x81   : > { %916 = vmatprep.subr.bf16.mxu0 %v2917_v6  ;;  %896 = vmatpush2.bf16.msra.mxu1 %v2442_v5  ;;  %v2484_v5 = vld [vmem:[#allocation4 + $0x2c] ss:$16 sps:$4 sm:$0xff]  }
  0x84   : > { %917 = vmatpush1.bf16.msra.mxu0 %v2923_v7 }
  0x85   : > { %918 = vmatprep.subr.bf16.mxu0 %v2932_v8 }
  0x88   : > { %919 = vmatpush1.bf16.msra.mxu0 %v2938_v9 }
  0x89   : > { %920 = vmatprep.subr.bf16.mxu0 %v2945_v10 }
  0x8c   : > { %921 = vmatpush1.bf16.msra.mxu0 %v2958_v11 }
  0x8d   : > { %922 = vmatprep.subr.bf16.mxu0 %v2964_v12 }
  0x90   : > { %923 = vmatpush1.bf16.msra.mxu0 %v2969_v13 }
  0x91   : > { %924 = vmatprep.subr.bf16.mxu0 %v2981_v18 }
  0x94   : > { %925 = vmatpush1.bf16.msra.mxu0 %v2988_v23 }
  0x95   : > { %926 = vmatprep.subr.bf16.mxu0 %v2994_v24 }
  0x98   : > { %927 = vmatpush2.bf16.msra.mxu0 %v2999_v25 }
  0x99   : > { %928 = vmatprep.subr.bf16.mxu0 %v3005_v28  ;;  %v2445_v28 = vld [vmem:[#allocation4 + $0xe4] ss:$16 sps:$4 sm:$0xff]  }
  0x9a   : > { %1403 = vmatprep.subr.bf16.mxu1 %v2445_v28  ;;  %v2517_v28 = vld [vmem:[#allocation4 + $0x164] ss:$16 sps:$4 sm:$0xff]  }
  0x9c   : > { %929 = vmatpush2.bf16.msra.mxu0 %v3011_v31  ;;  %v2449_v31 = vld [vmem:[#allocation4 + $0xc0] ss:$16 sps:$4 sm:$0xff]  }
  0x9d   : > { %930 = vmatprep.subr.bf16.mxu0 %v3016_v32  ;;  %v2457_v32 = vld [vmem:[#allocation4 + $0xa4] ss:$16 sps:$4 sm:$0xff]  }
  0xa0   : > { %931 = vmatpush2.bf16.msra.mxu0 %v2379_v35  ;;  %v2469_v35 = vld [vmem:[#allocation4 + $0x64] ss:$16 sps:$4 sm:$0xff]  }
  0xa1   : > { %932 = vmatprep.subr.bf16.mxu0 %v2380_v36  ;;  %v2467_v36 = vld [vmem:[#allocation4 + $0x60] ss:$16 sps:$4 sm:$0xff]  }
  0xa4   : > { %933 = vmatpush2.bf16.msra.mxu0 %v2382_v39  ;;  %v2481_v39 = vld [vmem:[#allocation4 + $0x24] ss:$16 sps:$4 sm:$0xff]  }
  0xa5   : > { %934 = vmatprep.subr.bf16.mxu0 %v2383_v40  ;;  %v2479_v40 = vld [vmem:[#allocation4 + $0x20] ss:$16 sps:$4 sm:$0xff]  }
  0xa8   : > { %935 = vmatpush2.bf16.msra.mxu0 %v2385_v43  ;;  %v3087_v43 = vsub.s32 0, %v3084_v42 }
  0xa9   : > { %936 = vmatprep.subr.bf16.mxu0 %v2386_v44  ;;  %v693_v44 = vld [vmem:[%s3144_s3] sm:$0x3] }
  0xac   : > { %937 = vmatpush2.bf16.msra.mxu0 %v2388_v46  ;;  %v698_v46 = vrot.slane %v693_v44, %v3087_v43 }
  0xad   : > { %938 = vmatprep.subr.bf16.mxu0 %v2389_v47  ;;  %v702_v47 = vrot.slane %v693_v44, %v3093_v45  ;;  %v2536_v44 = vld [vmem:[#allocation4 + $0x108] ss:$16 sps:$4 sm:$0xff]  }
  0xb0   : > { %939 = vmatpush2.bf16.msra.mxu0 %v2391_v48 }
  0xb1   : > { %940 = vmatprep.subr.bf16.mxu0 %v2392_v50 }
  0xb4   : > { %941 = vmatpush2.bf16.msra.mxu0 %v2394_v51 }
  0xb5   : > { %1444 = vmatprep.subr.bf16.mxu0 %v2448_v29  ;;  %v2520_v29 = vld [vmem:[#allocation4 + $0x16c] ss:$16 sps:$4 sm:$0xff]  }
 0x137   : > { %v636_v6 = vpop.f32.mrf.mxu0 }
 0x138   : > { %v645_v8 = vmul.f32 %v636_v6, %v636_v6  ;;  %v651_v20 = vsub.f32 %v3050_v49, %v636_v6  ;;  %v2482_v6 = vld [vmem:[#allocation4 + $0x28] ss:$16 sps:$4 sm:$0xff]  }
 0x139   : > { %v638_v7 = vpop.f32.mrf.mxu0 }
 0x13a   : > { %v646_v10 = vmul.f32 %v638_v7, %v638_v7  ;;  %v652_v21 = vsub.f32 %v2972_v14, %v638_v7  ;;  %v2463_v14 = vld [vmem:[#allocation4 + $0x84] ss:$16 sps:$4 sm:$0xff]  }
 0x13b   : > { %v640_v9 = vpop.f32.mrf.mxu0  ;;  %v2487_v7 = vld [vmem:[#allocation4 + $0x4] ss:$16 sps:$4 sm:$0xff]  }
 0x13c   : > { %v647_v11 = vsub.f32 %v640_v9, %v645_v8  ;;  %v2490_v8 = vld [vmem:[#allocation4 + $0xc] ss:$16 sps:$4 sm:$0xff]   ;;  %v2485_v9 = vld [vmem:[#allocation4] ss:$16 sps:$4 sm:$0xff]  }
 0x13d   : > { %v642_v12 = vpop.f32.mrf.mxu0 }
 0x13e   : > { %v649_v13 = vmax.f32 %v647_v11, 0.0  ;;  %v648_v15 = vsub.f32 %v642_v12, %v646_v10  ;;  %v2488_v10 = vld [vmem:[#allocation4 + $0x8] ss:$16 sps:$4 sm:$0xff]   ;;  %v2493_v11 = vld [vmem:[#allocation4 + $0x1e4] ss:$16 sps:$4 sm:$0xff]  }
 0x13f   : > { %v2496_v12 = vld [vmem:[#allocation4 + $0x1ec] ss:$16 sps:$4 sm:$0xff]  }
 0x140   : > { %v653_v16 = vadd.f32 1e-06, %v649_v13  ;;  %v650_v17 = vmax.f32 %v648_v15, 0.0  ;;  %v2491_v13 = vld [vmem:[#allocation4 + $0x1e0] ss:$16 sps:$4 sm:$0xff]  }
 0x141   : > { %v2494_v15 = vld [vmem:[#allocation4 + $0x1e8] ss:$16 sps:$4 sm:$0xff]  }
 0x142   : > { %2635 = vrsqrt.f32 %v653_v16  ;;  %v654_v18 = vadd.f32 1e-06, %v650_v17  ;;  %v2499_v16 = vld [vmem:[#allocation4 + $0x1c4] ss:$16 sps:$4 sm:$0xff]   ;;  %v2502_v17 = vld [vmem:[#allocation4 + $0x1cc] ss:$16 sps:$4 sm:$0xff]  }
 0x144   : > { %2637 = vrsqrt.f32 %v654_v18  ;;  %v2497_v18 = vld [vmem:[#allocation4 + $0x1c0] ss:$16 sps:$4 sm:$0xff]  }
 0x14f   : > { %v2636_v19 = vpop.eup %2635 }
 0x150   : > { %v657_v23 = vmul.f32 %v2636_v19, %v651_v20  ;;  %v2500_v19 = vld [vmem:[#allocation4 + $0x1c8] ss:$16 sps:$4 sm:$0xff]   ;;  %v2505_v20 = vld [vmem:[#allocation4 + $0x1a4] ss:$16 sps:$4 sm:$0xff]  }
 0x151   : > { %v2638_v22 = vpop.eup %2637 }
 0x152   : > { %v658_v24 = vmul.f32 %v2638_v22, %v652_v21  ;;  %v659_v26 = vpack.c.bf16 %v657_v23, %v657_v23  ;;  %v2508_v21 = vld [vmem:[#allocation4 + $0x1ac] ss:$16 sps:$4 sm:$0xff]   ;;  %v2503_v22 = vld [vmem:[#allocation4 + $0x1a0] ss:$16 sps:$4 sm:$0xff]   ;;  %v2506_v23 = vld [vmem:[#allocation4 + $0x1a8] ss:$16 sps:$4 sm:$0xff]  }
 0x154   : > { %v660_v25 = vpack.c.bf16 %v658_v24, %v658_v24  ;;  %v2509_v24 = vld [vmem:[#allocation4 + $0x180] ss:$16 sps:$4 sm:$0xff]  }
 0x156   : > { %897 = vmatprep.mubr.bf16.mxu1 %v660_v25  ;;  %v2511_v25 = vld [vmem:[#allocation4 + $0x184] ss:$16 sps:$4 sm:$0xff]  }
 0x157   : > { %898 = vmatmul.mubr.bf16.vlgmr.msra.gmra.mxu1 %v659_v26  ;;  %v2512_v26 = vld [vmem:[#allocation4 + $0x188] ss:$16 sps:$4 sm:$0xff]  }
 0x158   : > { %1404 = vmatpush1.bf16.msra.mxu1 %v2443_v27  ;;  %v2514_v27 = vld [vmem:[#allocation4 + $0x18c] ss:$16 sps:$4 sm:$0xff]  }
 0x159   : > { %1405 = vmatprep.subr.bf16.mxu1 %v2451_v30  ;;  %v2515_v30 = vld [vmem:[#allocation4 + $0x160] ss:$16 sps:$4 sm:$0xff]  }
 0x15c   : > { %1406 = vmatpush1.bf16.msra.mxu1 %v2449_v31  ;;  %v2518_v31 = vld [vmem:[#allocation4 + $0x168] ss:$16 sps:$4 sm:$0xff]  }
 0x15d   : > { %1407 = vmatprep.subr.bf16.mxu1 %v2457_v32  ;;  %v2523_v32 = vld [vmem:[#allocation4 + $0x144] ss:$16 sps:$4 sm:$0xff]  }
 0x160   : > { %1408 = vmatpush1.bf16.msra.mxu1 %v2455_v33  ;;  %v2526_v33 = vld [vmem:[#allocation4 + $0x14c] ss:$16 sps:$4 sm:$0xff]  }
 0x161   : > { %1409 = vmatprep.subr.bf16.mxu1 %v2463_v14  ;;  %v2521_v14 = vld [vmem:[#allocation4 + $0x140] ss:$16 sps:$4 sm:$0xff]  }
 0x164   : > { %1410 = vmatpush1.bf16.msra.mxu1 %v2461_v34  ;;  %v2524_v34 = vld [vmem:[#allocation4 + $0x148] ss:$16 sps:$4 sm:$0xff]  }
 0x165   : > { %1411 = vmatprep.subr.bf16.mxu1 %v2469_v35  ;;  %v2529_v35 = vld [vmem:[#allocation4 + $0x124] ss:$16 sps:$4 sm:$0xff]  }
 0x168   : > { %1412 = vmatpush1.bf16.msra.mxu1 %v2467_v36  ;;  %v2532_v36 = vld [vmem:[#allocation4 + $0x12c] ss:$16 sps:$4 sm:$0xff]  }
 0x169   : > { %1413 = vmatprep.subr.bf16.mxu1 %v2475_v37  ;;  %v2527_v37 = vld [vmem:[#allocation4 + $0x120] ss:$16 sps:$4 sm:$0xff]  }
 0x16c   : > { %1414 = vmatpush1.bf16.msra.mxu1 %v2473_v38  ;;  %v2530_v38 = vld [vmem:[#allocation4 + $0x128] ss:$16 sps:$4 sm:$0xff]  }
 0x16d   : > { %1415 = vmatprep.subr.bf16.mxu1 %v2481_v39  ;;  %v2535_v39 = vld [vmem:[#allocation4 + $0x104] ss:$16 sps:$4 sm:$0xff]  }
 0x170   : > { %1416 = vmatpush1.bf16.msra.mxu1 %v2479_v40  ;;  %v2538_v40 = vld [vmem:[#allocation4 + $0x10c] ss:$16 sps:$4 sm:$0xff]  }
 0x171   : > { %1417 = vmatprep.subr.bf16.mxu1 %v2487_v7 }
 0x174   : > { %1418 = vmatpush1.bf16.msra.mxu1 %v2485_v9 }
 0x175   : > { %1419 = vmatprep.subr.bf16.mxu1 %v2493_v11 }
 0x178   : > { %1420 = vmatpush2.bf16.msra.mxu1 %v2491_v13 }
 0x179   : > { %1421 = vmatprep.subr.bf16.mxu1 %v2499_v16  ;;  %v2542_v16 = vld [vmem:[#allocation6 + $0x170] ss:$8 sps:$4 sm:$0xff]  }
 0x17c   : > { %1422 = vmatpush2.bf16.msra.mxu1 %v2497_v18  ;;  %v2547_v18 = vld [vmem:[#allocation6 + $0x64] ss:$8 sps:$4 sm:$0xff]  }
 0x17d   : > { %1423 = vmatprep.subr.bf16.mxu1 %v2505_v20  ;;  %v2548_v20 = vld [vmem:[#allocation6 + $0x160] ss:$8 sps:$4 sm:$0xff]  }
 0x180   : > { %1424 = vmatpush2.bf16.msra.mxu1 %v2503_v22  ;;  %v2556_v22 = vld [vmem:[#allocation6 + $0x154] ss:$8 sps:$4 sm:$0xff]  }
 0x181   : > { %1425 = vmatprep.subr.bf16.mxu1 %v2511_v25  ;;  %v2559_v25 = vld [vmem:[#allocation6 + $0x44] ss:$8 sps:$4 sm:$0xff]  }
 0x184   : > { %1426 = vmatpush2.bf16.msra.mxu1 %v2509_v24  ;;  %v2554_v24 = vld [vmem:[#allocation6 + $0x150] ss:$8 sps:$4 sm:$0xff]  }
 0x185   : > { %1427 = vmatprep.subr.bf16.mxu1 %v2517_v28  ;;  %v2560_v28 = vld [vmem:[#allocation6 + $0x140] ss:$8 sps:$4 sm:$0xff]  }
 0x188   : > { %1428 = vmatpush2.bf16.msra.mxu1 %v2515_v30  ;;  %v2568_v30 = vld [vmem:[#allocation6 + $0x134] ss:$8 sps:$4 sm:$0xff]  }
 0x189   : > { %1429 = vmatprep.subr.bf16.mxu1 %v2523_v32  ;;  %v2566_v32 = vld [vmem:[#allocation6 + $0x130] ss:$8 sps:$4 sm:$0xff]  }
 0x18c   : > { %1430 = vmatpush2.bf16.msra.mxu1 %v2521_v14  ;;  %v2574_v14 = vld [vmem:[#allocation6 + $0x124] ss:$8 sps:$4 sm:$0xff]  }
 0x18d   : > { %1431 = vmatprep.subr.bf16.mxu1 %v2529_v35  ;;  %v2572_v35 = vld [vmem:[#allocation6 + $0x120] ss:$8 sps:$4 sm:$0xff]  }
 0x190   : > { %1432 = vmatpush2.bf16.msra.mxu1 %v2527_v37  ;;  %v2580_v37 = vld [vmem:[#allocation6 + $0x114] ss:$8 sps:$4 sm:$0xff]  }
 0x191   : > { %1433 = vmatprep.subr.bf16.mxu1 %v2535_v39  ;;  %v2578_v39 = vld [vmem:[#allocation6 + $0x110] ss:$8 sps:$4 sm:$0xff]  }
 0x194   : > { %1434 = vmatpush2.bf16.msra.mxu1 %v2533_v41  ;;  %v2586_v41 = vld [vmem:[#allocation6 + $0x104] ss:$8 sps:$4 sm:$0xff]  }
 0x217   : > { %v899_v48 = vpop.f32.mrf.mxu1 }
 0x218   : > { %v3097_v49 = vadd.f32 %v899_v48, %v698_v46  ;;  %v2541_v46 = vld [vmem:[#allocation6 + $0x74] ss:$8 sps:$4 sm:$0xff]  }
 0x219   : > { %v901_v50 = vpop.f32.mrf.mxu1  ;;  %1921 = vmatprep.subr.bf16.mxu1 %v2541_v46  ;;  %v2584_v46 = vld [vmem:[#allocation6 + $0x100] ss:$8 sps:$4 sm:$0xff]  }
 0x21a   : > { %v3099_v51 = vadd.f32 %v901_v50, %v702_v47  ;;  %v906_v52 = vmul.f32 %v3097_v49, %v3097_v49  ;;  %v2544_v47 = vld [vmem:[#allocation6 + $0x174] ss:$8 sps:$4 sm:$0xff]  }
 0x21b   : > { %v903_v53 = vpop.f32.mrf.mxu1 }
 0x21c   : > { %v907_v54 = vmul.f32 %v3099_v51, %v3099_v51  ;;  %v908_v58 = vpack.c.bf16 %v906_v52, %v3097_v49 }
 0x21d   : > { %v904_v55 = vpop.f32.mrf.mxu1 }
 0x21e   : > { %v909_v56 = vpack.c.bf16 %v907_v54, %v3099_v51 }
 0x220   : > { %942 = vmatprep.mubr.bf16.mxu0 %v909_v56 }
 0x221   : > { %943 = vmatmul.mubr.bf16.vlgmr.msra.gmra.mxu0 %v908_v58 }
 0x222   : > { %1445 = vmatpush1.bf16.msra.mxu0 %v2446_v57 }
 0x223   : > { %1446 = vmatprep.subr.bf16.mxu0 %v2454_v59 }
 0x226   : > { %1447 = vmatpush1.bf16.msra.mxu0 %v2452_v60 }
 0x227   : > { %1448 = vmatprep.subr.bf16.mxu0 %v2460_v61 }
 0x22a   : > { %1449 = vmatpush1.bf16.msra.mxu0 %v2458_v62  ;;  %v967_v62 = vld [vmem:[%s3145_s4] sm:$0x3] }
 0x22b   : > { %1450 = vmatprep.subr.bf16.mxu0 %v2466_v63 }
 0x22e   : > { %1451 = vmatpush1.bf16.msra.mxu0 %v2464_v0  ;;  %v972_v0 = vrot.slane %v967_v62, %v3087_v43 }
 0x22f   : > { %1452 = vmatprep.subr.bf16.mxu0 %v2472_v1  ;;  %v981_v1 = vld [vmem:[%s3146_s5] sm:$0x3] }
 0x230   : > { %v986_v7 = vrot.slane %v981_v1, %v3087_v43  ;;  %v990_v9 = vrot.slane %v981_v1, %v3093_v45  ;;  %v2613_v1 = vld [vmem:[#allocation6 + $0xb4] ss:$8 sps:$4 sm:$0xff]  }
 0x232   : > { %1453 = vmatpush1.bf16.msra.mxu0 %v2470_v2 }
 0x233   : > { %1454 = vmatprep.subr.bf16.mxu0 %v2478_v3 }
 0x236   : > { %1455 = vmatpush1.bf16.msra.mxu0 %v2476_v4  ;;  %v976_v4 = vrot.slane %v967_v62, %v3093_v45  ;;  %v2610_v62 = vld [vmem:[#allocation6 + $0x1c4] ss:$8 sps:$4 sm:$0xff]  }
 0x237   : > { %1456 = vmatprep.subr.bf16.mxu0 %v2484_v5 }
 0x23a   : > { %1457 = vmatpush1.bf16.msra.mxu0 %v2482_v6 }
 0x23b   : > { %1458 = vmatprep.subr.bf16.mxu0 %v2490_v8 }
 0x23e   : > { %1459 = vmatpush1.bf16.msra.mxu0 %v2488_v10 }
 0x23f   : > { %1460 = vmatprep.subr.bf16.mxu0 %v2496_v12 }
 0x242   : > { %1461 = vmatpush2.bf16.msra.mxu0 %v2494_v15  ;;  %v2539_v15 = vld [vmem:[#allocation6 + $0x70] ss:$8 sps:$4 sm:$0xff]  }
 0x243   : > { %1462 = vmatprep.subr.bf16.mxu0 %v2502_v17 }
 0x246   : > { %1463 = vmatpush2.bf16.msra.mxu0 %v2500_v19  ;;  %v2550_v19 = vld [vmem:[#allocation6 + $0x164] ss:$8 sps:$4 sm:$0xff]  }
 0x247   : > { %1464 = vmatprep.subr.bf16.mxu0 %v2508_v21  ;;  %v2553_v21 = vld [vmem:[#allocation6 + $0x54] ss:$8 sps:$4 sm:$0xff]  }
 0x24a   : > { %1465 = vmatpush2.bf16.msra.mxu0 %v2506_v23  ;;  %v2551_v23 = vld [vmem:[#allocation6 + $0x50] ss:$8 sps:$4 sm:$0xff]  }
 0x24b   : > { %1466 = vmatprep.subr.bf16.mxu0 %v2514_v27  ;;  %v2557_v27 = vld [vmem:[#allocation6 + $0x40] ss:$8 sps:$4 sm:$0xff]  }
 0x24e   : > { %1467 = vmatpush2.bf16.msra.mxu0 %v2512_v26  ;;  %v2562_v26 = vld [vmem:[#allocation6 + $0x144] ss:$8 sps:$4 sm:$0xff]  }
 0x24f   : > { %1468 = vmatprep.subr.bf16.mxu0 %v2520_v29  ;;  %v2565_v29 = vld [vmem:[#allocation6 + $0x34] ss:$8 sps:$4 sm:$0xff]  }
 0x252   : > { %1469 = vmatpush2.bf16.msra.mxu0 %v2518_v31  ;;  %v2563_v31 = vld [vmem:[#allocation6 + $0x30] ss:$8 sps:$4 sm:$0xff]  }
 0x253   : > { %1470 = vmatprep.subr.bf16.mxu0 %v2526_v33  ;;  %v2571_v33 = vld [vmem:[#allocation6 + $0x24] ss:$8 sps:$4 sm:$0xff]  }
 0x256   : > { %1471 = vmatpush2.bf16.msra.mxu0 %v2524_v34  ;;  %v2569_v34 = vld [vmem:[#allocation6 + $0x20] ss:$8 sps:$4 sm:$0xff]  }
 0x257   : > { %1472 = vmatprep.subr.bf16.mxu0 %v2532_v36  ;;  %v2577_v36 = vld [vmem:[#allocation6 + $0x14] ss:$8 sps:$4 sm:$0xff]  }
 0x25a   : > { %1473 = vmatpush2.bf16.msra.mxu0 %v2530_v38  ;;  %v2575_v38 = vld [vmem:[#allocation6 + $0x10] ss:$8 sps:$4 sm:$0xff]  }
 0x25b   : > { %1474 = vmatprep.subr.bf16.mxu0 %v2538_v40  ;;  %v2583_v40 = vld [vmem:[#allocation6 + $0x4] ss:$8 sps:$4 sm:$0xff]  }
 0x25e   : > { %1475 = vmatpush2.bf16.msra.mxu0 %v2536_v44  ;;  %v2581_v44 = vld [vmem:[#allocation6] ss:$8 sps:$4 sm:$0xff]  }
 0x25f   : > { %1962 = vmatprep.subr.bf16.mxu0 %v2544_v47  ;;  %v2589_v47 = vld [vmem:[#allocation6 + $0xf4] ss:$8 sps:$4 sm:$0xff]  }
 0x2e1   : > { %v944_v48 = vpop.f32.mrf.mxu0 }
 0x2e2   : > { %v953_v52 = vmul.f32 %v944_v48, %v944_v48  ;;  %v959_v63 = vsub.f32 %v3097_v49, %v944_v48  ;;  %v2592_v48 = vld [vmem:[#allocation6 + $0x1f4] ss:$8 sps:$4 sm:$0xff]  }
 0x2e3   : > { %v946_v50 = vpop.f32.mrf.mxu0 }
 0x2e4   : > { %v954_v54 = vmul.f32 %v946_v50, %v946_v50  ;;  %v960_v3 = vsub.f32 %v3099_v51, %v946_v50  ;;  %v2545_v51 = vld [vmem:[#allocation6 + $0x60] ss:$8 sps:$4 sm:$0xff]   ;;  %v2587_v50 = vld [vmem:[#allocation6 + $0xf0] ss:$8 sps:$4 sm:$0xff]  }
 0x2e5   : > { %v948_v53 = vpop.f32.mrf.mxu0 }
 0x2e6   : > { %v955_v55 = vsub.f32 %v948_v53, %v953_v52  ;;  %v2590_v52 = vld [vmem:[#allocation6 + $0x1f0] ss:$8 sps:$4 sm:$0xff]   ;;  %v2595_v53 = vld [vmem:[#allocation6 + $0xe4] ss:$8 sps:$4 sm:$0xff]  }
 0x2e7   : > { %v950_v56 = vpop.f32.mrf.mxu0 }
 0x2e8   : > { %v957_v57 = vmax.f32 %v955_v55, 0.0  ;;  %v956_v58 = vsub.f32 %v950_v56, %v954_v54  ;;  %v2598_v54 = vld [vmem:[#allocation6 + $0x1e4] ss:$8 sps:$4 sm:$0xff]   ;;  %v2593_v55 = vld [vmem:[#allocation6 + $0xe0] ss:$8 sps:$4 sm:$0xff]  }
 0x2e9   : > { %v2596_v56 = vld [vmem:[#allocation6 + $0x1e0] ss:$8 sps:$4 sm:$0xff]  }
 0x2ea   : > { %v961_v59 = vadd.f32 1e-06, %v957_v57  ;;  %v958_v60 = vmax.f32 %v956_v58, 0.0  ;;  %v2601_v57 = vld [vmem:[#allocation6 + $0xd4] ss:$8 sps:$4 sm:$0xff]  }
 0x2eb   : > { %v2604_v58 = vld [vmem:[#allocation6 + $0x1d4] ss:$8 sps:$4 sm:$0xff]  }
 0x2ec   : > { %2639 = vrsqrt.f32 %v961_v59  ;;  %v962_v61 = vadd.f32 1e-06, %v958_v60  ;;  %v2599_v59 = vld [vmem:[#allocation6 + $0xd0] ss:$8 sps:$4 sm:$0xff]  }
 0x2ed   : > { %v2602_v60 = vld [vmem:[#allocation6 + $0x1d0] ss:$8 sps:$4 sm:$0xff]  }
 0x2ee   : > { %2641 = vrsqrt.f32 %v962_v61  ;;  %v2607_v61 = vld [vmem:[#allocation6 + $0xc4] ss:$8 sps:$4 sm:$0xff]  }
 0x2f9   : > { %v2640_v2 = vpop.eup %2639 }
 0x2fa   : > { %v965_v5 = vmul.f32 %v2640_v2, %v959_v63  ;;  %v2605_v63 = vld [vmem:[#allocation6 + $0xc0] ss:$8 sps:$4 sm:$0xff]   ;;  %v2616_v2 = vld [vmem:[#allocation6 + $0x1b4] ss:$8 sps:$4 sm:$0xff]  }
 0x2fb   : > { %v2642_v6 = vpop.eup %2641 }
 0x2fc   : > { %v966_v8 = vmul.f32 %v2642_v6, %v960_v3  ;;  %v979_v10 = vmul.f32 %v972_v0, %v965_v5  ;;  %v2608_v0 = vld [vmem:[#allocation6 + $0x1c0] ss:$8 sps:$4 sm:$0xff]   ;;  %v2611_v3 = vld [vmem:[#allocation6 + $0xb0] ss:$8 sps:$4 sm:$0xff]   ;;  %v2619_v5 = vld [vmem:[#allocation6 + $0xa4] ss:$8 sps:$4 sm:$0xff]  }
 0x2fd   : > { %v2622_v6 = vld [vmem:[#allocation6 + $0x1a4] ss:$8 sps:$4 sm:$0xff]  }
 0x2fe   : > { %v980_v49 = vmul.f32 %v976_v4, %v966_v8  ;;  %v993_v11 = vadd.f32 %v986_v7, %v979_v10  ;;  %v2614_v4 = vld [vmem:[#allocation6 + $0x1b0] ss:$8 sps:$4 sm:$0xff]   ;;  %v2617_v7 = vld [vmem:[#allocation6 + $0xa0] ss:$8 sps:$4 sm:$0xff]   ;;  %v2628_v10 = vld [vmem:[#allocation6 + $0x194] ss:$8 sps:$4 sm:$0xff]  }
 0x2ff   : > { %v2620_v8 = vld [vmem:[#allocation6 + $0x1a0] ss:$8 sps:$4 sm:$0xff]  }
 0x300   : > { %v994_v12 = vadd.f32 %v990_v9, %v980_v49  ;;  %v995_v17 = vpack.c.bf16 %v993_v11, %v993_v11  ;;  %v2625_v9 = vld [vmem:[#allocation6 + $0x94] ss:$8 sps:$4 sm:$0xff]   ;;  %v2623_v49 = vld [vmem:[#allocation6 + $0x90] ss:$8 sps:$4 sm:$0xff]  }
 0x301   : > { %v2626_v11 = vld [vmem:[#allocation6 + $0x190] ss:$8 sps:$4 sm:$0xff]  }
 0x302   : > { %v996_v13 = vpack.c.bf16 %v994_v12, %v994_v12  ;;  %v2631_v12 = vld [vmem:[#allocation6 + $0x84] ss:$8 sps:$4 sm:$0xff]  }
 0x304   : > { %1435 = vmatprep.mubr.bf16.mxu1 %v996_v13  ;;  %1476 = vmatprep.mubr.bf16.mxu0 %v996_v13  ;;  %v2634_v13 = vld [vmem:[#allocation6 + $0x184] ss:$8 sps:$4 sm:$0xff]  }
 0x305   : > { %1436 = vmatmul.mubr.bf16.vlgmr.msra.gmra.mxu1 %v995_v17  ;;  %1477 = vmatmul.mubr.bf16.vlgmr.msra.gmra.mxu0 %v995_v17  ;;  %v1073_v17 = vsub.s32 2, %v3084_v42 }
 0x306   : > { %1922 = vmatpush1.bf16.msra.mxu1 %v2539_v15  ;;  %1963 = vmatpush1.bf16.msra.mxu0 %v2542_v16  ;;  %v2629_v15 = vld [vmem:[#allocation6 + $0x80] ss:$8 sps:$4 sm:$0xff]  }
 0x307   : > { %1923 = vmatprep.subr.bf16.mxu1 %v2547_v18  ;;  %1964 = vmatprep.subr.bf16.mxu0 %v2550_v19  ;;  %v2632_v16 = vld [vmem:[#allocation6 + $0x180] ss:$8 sps:$4 sm:$0xff]   ;;  %v1077_v19 = vsub.s32 3, %v3084_v42 }
 0x308   : > { %v1061_v18 = vld [vmem:[%s3148_s7] sm:$0xf] }
 0x30a   : > { %1924 = vmatpush1.bf16.msra.mxu1 %v2545_v51  ;;  %1965 = vmatpush1.bf16.msra.mxu0 %v2548_v20  ;;  %v1066_v51 = vrot.slane %v1061_v18, %v3087_v43  ;;  %v1074_v20 = vrot.slane %v1061_v18, %v1073_v17 }
 0x30b   : > { %1925 = vmatprep.subr.bf16.mxu1 %v2553_v21  ;;  %1966 = vmatprep.subr.bf16.mxu0 %v2556_v22  ;;  %v1070_v21 = vrot.slane %v1061_v18, %v3093_v45  ;;  %v1078_v22 = vrot.slane %v1061_v18, %v1077_v19 }
 0x30e   : > { %1926 = vmatpush1.bf16.msra.mxu1 %v2551_v23  ;;  %1967 = vmatpush1.bf16.msra.mxu0 %v2554_v24 }
 0x30f   : > { %1927 = vmatprep.subr.bf16.mxu1 %v2559_v25  ;;  %1968 = vmatprep.subr.bf16.mxu0 %v2562_v26 }
 0x312   : > { %1928 = vmatpush1.bf16.msra.mxu1 %v2557_v27  ;;  %1969 = vmatpush1.bf16.msra.mxu0 %v2560_v28 }
 0x313   : > { %1929 = vmatprep.subr.bf16.mxu1 %v2565_v29  ;;  %1970 = vmatprep.subr.bf16.mxu0 %v2568_v30 }
 0x316   : > { %1930 = vmatpush1.bf16.msra.mxu1 %v2563_v31  ;;  %1971 = vmatpush1.bf16.msra.mxu0 %v2566_v32 }
 0x317   : > { %1931 = vmatprep.subr.bf16.mxu1 %v2571_v33  ;;  %1972 = vmatprep.subr.bf16.mxu0 %v2574_v14 }
 0x31a   : > { %1932 = vmatpush1.bf16.msra.mxu1 %v2569_v34  ;;  %1973 = vmatpush1.bf16.msra.mxu0 %v2572_v35 }
 0x31b   : > { %1933 = vmatprep.subr.bf16.mxu1 %v2577_v36  ;;  %1974 = vmatprep.subr.bf16.mxu0 %v2580_v37 }
 0x31e   : > { %1934 = vmatpush1.bf16.msra.mxu1 %v2575_v38  ;;  %1975 = vmatpush1.bf16.msra.mxu0 %v2578_v39 }
 0x31f   : > { %1935 = vmatprep.subr.bf16.mxu1 %v2583_v40  ;;  %1976 = vmatprep.subr.bf16.mxu0 %v2586_v41 }
 0x322   : > { %1936 = vmatpush1.bf16.msra.mxu1 %v2581_v44  ;;  %1977 = vmatpush1.bf16.msra.mxu0 %v2584_v46 }
 0x323   : > { %1937 = vmatprep.subr.bf16.mxu1 %v2589_v47  ;;  %1978 = vmatprep.subr.bf16.mxu0 %v2592_v48 }
 0x326   : > { %1938 = vmatpush2.bf16.msra.mxu1 %v2587_v50  ;;  %1979 = vmatpush2.bf16.msra.mxu0 %v2590_v52 }
 0x327   : > { %1939 = vmatprep.subr.bf16.mxu1 %v2595_v53  ;;  %1980 = vmatprep.subr.bf16.mxu0 %v2598_v54 }
 0x32a   : > { %1940 = vmatpush2.bf16.msra.mxu1 %v2593_v55  ;;  %1981 = vmatpush2.bf16.msra.mxu0 %v2596_v56 }
 0x32b   : > { %1941 = vmatprep.subr.bf16.mxu1 %v2601_v57  ;;  %1982 = vmatprep.subr.bf16.mxu0 %v2604_v58 }
 0x32e   : > { %1942 = vmatpush2.bf16.msra.mxu1 %v2599_v59  ;;  %1983 = vmatpush2.bf16.msra.mxu0 %v2602_v60 }
 0x32f   : > { %1943 = vmatprep.subr.bf16.mxu1 %v2607_v61  ;;  %1984 = vmatprep.subr.bf16.mxu0 %v2610_v62 }
 0x332   : > { %1944 = vmatpush2.bf16.msra.mxu1 %v2605_v63  ;;  %1985 = vmatpush2.bf16.msra.mxu0 %v2608_v0 }
 0x333   : > { %1945 = vmatprep.subr.bf16.mxu1 %v2613_v1  ;;  %1986 = vmatprep.subr.bf16.mxu0 %v2616_v2 }
 0x336   : > { %1946 = vmatpush2.bf16.msra.mxu1 %v2611_v3  ;;  %1987 = vmatpush2.bf16.msra.mxu0 %v2614_v4 }
 0x337   : > { %1947 = vmatprep.subr.bf16.mxu1 %v2619_v5  ;;  %1988 = vmatprep.subr.bf16.mxu0 %v2622_v6 }
 0x33a   : > { %1948 = vmatpush2.bf16.msra.mxu1 %v2617_v7  ;;  %1989 = vmatpush2.bf16.msra.mxu0 %v2620_v8 }
 0x33b   : > { %1949 = vmatprep.subr.bf16.mxu1 %v2625_v9  ;;  %1990 = vmatprep.subr.bf16.mxu0 %v2628_v10 }
 0x33e   : > { %1950 = vmatpush2.bf16.msra.mxu1 %v2623_v49  ;;  %1991 = vmatpush2.bf16.msra.mxu0 %v2626_v11 }
 0x33f   : > { %1951 = vmatprep.subr.bf16.mxu1 %v2631_v12  ;;  %1992 = vmatprep.subr.bf16.mxu0 %v2634_v13  ;;  %v1589_v13 = vld [vmem:[%s3150_s9] sm:$0x3] }
 0x342   : > { %1952 = vmatpush2.bf16.msra.mxu1 %v2629_v15  ;;  %1993 = vmatpush2.bf16.msra.mxu0 %v2632_v16  ;;  %v1594_v15 = vrot.slane %v1589_v13, %v3087_v43  ;;  %v1598_v16 = vrot.slane %v1589_v13, %v3093_v45  ;;  %v2652_v45 = vld [vmem:[%s2952_s25 + $0x8] sm:$0xff] }
 0x3c5   : > { %v1437_v23 = vpop.f32.mrf.mxu1  ;;  %v1478_v24 = vpop.f32.mrf.mxu0 }
 0x3c6   : > { %v1438_v25 = vadd.f32 %v1437_v23, %v1066_v51  ;;  %v1479_v26 = vadd.f32 %v1478_v24, %v1074_v20  ;;  %v2651_v24 = vld [vmem:[%s2952_s25] sm:$0xff] }
 0x3c7   : > { %v1439_v27 = vpop.f32.mrf.mxu1  ;;  %v1480_v28 = vpop.f32.mrf.mxu0 }
 0x3c8   : > { %v1489_v29 = vmul.f32 0.044715, %v1438_v25  ;;  %v1491_v30 = vmul.f32 0.044715, %v1479_v26  ;;  %v1440_v31 = vadd.f32 %v1439_v27, %v1070_v21  ;;  %v1481_v32 = vadd.f32 %v1480_v28, %v1078_v22 }
 0x3c9   : > { %v1441_v33 = vpop.f32.mrf.mxu1  ;;  %v1482_v14 = vpop.f32.mrf.mxu0  ;;  %v1485_v62 = vmul.f32 0.5, %v1438_v25  ;;  %v1487_v3 = vmul.f32 0.5, %v1479_v26 }
 0x3ca   : > { %v1493_v34 = vmul.f32 %v1489_v29, %v1438_v25  ;;  %v1495_v42 = vmul.f32 %v1491_v30, %v1479_v26  ;;  %v1490_v35 = vmul.f32 0.044715, %v1440_v31  ;;  %v1492_v36 = vmul.f32 0.044715, %v1481_v32 }
 0x3cb   : > { %v1442_v37 = vpop.f32.mrf.mxu1  ;;  %v1483_v38 = vpop.f32.mrf.mxu0  ;;  %v1486_v1 = vmul.f32 0.5, %v1440_v31  ;;  %v1488_v4 = vmul.f32 0.5, %v1481_v32 }
 0x3cc   : > { %v1497_v39 = vmul.f32 %v1493_v34, %v1438_v25  ;;  %v1499_v40 = vmul.f32 %v1495_v42, %v1479_v26  ;;  %v1494_v41 = vmul.f32 %v1490_v35, %v1440_v31  ;;  %v1496_v44 = vmul.f32 %v1492_v36, %v1481_v32 }
 0x3ce   : > { %v1501_v46 = vadd.f32 %v1497_v39, %v1438_v25  ;;  %v1503_v47 = vadd.f32 %v1499_v40, %v1479_v26  ;;  %v1498_v48 = vmul.f32 %v1494_v41, %v1440_v31  ;;  %v1500_v50 = vmul.f32 %v1496_v44, %v1481_v32 }
 0x3d0   : > { %v1505_v52 = vmul.f32 0.7978846, %v1501_v46  ;;  %v1507_v53 = vmul.f32 0.7978846, %v1503_v47  ;;  %v1502_v54 = vadd.f32 %v1498_v48, %v1440_v31  ;;  %v1504_v55 = vadd.f32 %v1500_v50, %v1481_v32 }
 0x3d2   : > { %v1506_v56 = vmul.f32 0.7978846, %v1502_v54  ;;  %v1508_v57 = vmul.f32 0.7978846, %v1504_v55  ;;  %2643 = vtanh.f32 %v1505_v52 }
 0x3d3   : > { %2645 = vtanh.f32 %v1507_v53 }
 0x3d4   : > { %2647 = vtanh.f32 %v1506_v56 }
 0x3d5   : > { %2649 = vtanh.f32 %v1508_v57 }
 0x3df   : > { %v2644_v58 = vpop.eup %2643 }
 0x3e0   : > { %v2646_v59 = vpop.eup %2645  ;;  %v1513_v60 = vadd.f32 1.0, %v2644_v58 }
 0x3e1   : > { %v2648_v61 = vpop.eup %2647  ;;  %v1515_v63 = vadd.f32 1.0, %v2646_v59 }
 0x3e2   : > { %v2650_v0 = vpop.eup %2649  ;;  %v1514_v2 = vadd.f32 1.0, %v2648_v61  ;;  %v1517_v6 = vmul.f32 %v1513_v60, %v1485_v62 }
 0x3e3   : > { %v1516_v5 = vadd.f32 1.0, %v2650_v0  ;;  %v1519_v8 = vmul.f32 %v1515_v63, %v1487_v3 }
 0x3e4   : > { %v1518_v7 = vmul.f32 %v1514_v2, %v1486_v1  ;;  %v1521_v11 = vpack.c.bf16 %v1517_v6, %v1517_v6 }
 0x3e5   : > { %v1520_v9 = vmul.f32 %v1516_v5, %v1488_v4  ;;  %v1523_v12 = vpack.c.bf16 %v1519_v8, %v1519_v8 }
 0x3e6   : > { %v1522_v10 = vpack.c.bf16 %v1518_v7, %v1518_v7 }
 0x3e7   : > { %v1524_v49 = vpack.c.bf16 %v1520_v9, %v1520_v9 }
 0x3e8   : > { %1953 = vmatprep.mubr.bf16.mxu1 %v1522_v10 }
 0x3e9   : > { %1994 = vmatprep.mubr.bf16.mxu0 %v1524_v49  ;;  %1954 = vmatmul.mubr.bf16.vlgmr.msra.gmra.mxu1 %v1521_v11 }
 0x3ea   : > { %1995 = vmatmul.mubr.bf16.vlgmr.msra.gmra.mxu0 %v1523_v12 }
 0x4a9   : > { %v1955_v17 = vpop.f32.mrf.mxu1 }
 0x4aa   : > { %v1956_v18 = vadd.f32 %v1955_v17, %v1594_v15  ;;  %v1996_v19 = vpop.f32.mrf.mxu0 }
 0x4ab   : > { %v1957_v51 = vpop.f32.mrf.mxu1 }
 0x4ac   : > { %v1997_v20 = vadd.f32 %v1996_v19, %v1956_v18  ;;  %v1958_v21 = vadd.f32 %v1957_v51, %v1598_v16  ;;  %v1998_v22 = vpop.f32.mrf.mxu0 }
 0x4ad   : > { %v1959_v23 = vpop.f32.mrf.mxu1 }
 0x4ae   : > { %v2003_v25 = vadd.f32 %v2651_v24, %v1997_v20  ;;  %v1999_v26 = vadd.f32 %v1998_v22, %v1958_v21  ;;  %v2000_v43 = vpop.f32.mrf.mxu0 }
 0x4af   : > { %v1960_v27 = vpop.f32.mrf.mxu1 }
 0x4b0   : > { %2005 = vst [vmem:[%s403_s12] sm:$0xff] %v2003_v25  ;;  %v2004_v28 = vadd.f32 %v2652_v45, %v1999_v26  ;;  %v2001_v29 = vpop.f32.mrf.mxu0 }
 0x4b2   : > { %2006 = vst [vmem:[%s403_s12 + $0x8] sm:$0xff] %v2004_v28 }
 0x4b3 PF: > { %s22_s13 = sadd.s32 1, %s2745_s13  }
 0x4b4   : > { %p19_p3 = scmp.ge.s32.totalorder %s22_s13, 4  }
 0x4b6   :  { %21 = sbr.rel (!%p19_p3) target bundleno = 2 (0x2), region = 103 }
 0x4bb   :  { %2028 = vsyncpa [#allocation3], 1 }
 0x4bc   :  { %2030 = vsyncpa [#allocation3 + $0x1], 1 }
 0x4bd   :  { %2031 = vsyncpa [#allocation5], 1 }

</bundles_post_ra>
